<compile_context>
chip_gen: v6e
topology: v6e:2x2x1
jax: 0.10.0
libtpu: 0.0.40
codegen_flags: <defaults>
</compile_context>

<pallas_src>
import jax
import jax.numpy as jnp
from jax.experimental import pallas as pl
from jax.experimental.pallas import tpu as pltpu

IMAGE_SIZE = 784
H_DIM = 400
Z_DIM = 20

H_PAD = 512       # hidden dim zero-padded to 4*128 -> fully (8,128)-tiled h/h2
Z_PAD = 128       # z / eps zero-padded to one full lane tile
MULV_PAD = 256    # fused mu||log_var output: mu at cols 0:128, log_var at 128:256
PAD_OUT = 896     # 7*128: zero-padded fc5 output width -> unmasked stores


def _round_up(x, m):
    return ((x + m - 1) // m) * m


def vae_kernel(x_ref,
               w1_ref, b1_ref,
               w23_ref, b23_ref,
               w4_ref, b4_ref,
               w5_ref, b5_ref,
               eps_ref,
               xr_ref, mulv_ref):
    x = x_ref[...]                                               # [TB, 784] bf16

    # ---- encode: fc1 + relu (hidden padded to 512, pad cols stay 0) ----
    h = jnp.dot(x, w1_ref[...], preferred_element_type=jnp.float32) + b1_ref[...]
    h = jnp.maximum(h, 0.0)                                      # [TB, 512] f32

    # ---- fused fc2 || fc3: mu in cols 0:128, log_var in cols 128:256 ----
    mulv = jnp.dot(h.astype(jnp.bfloat16), w23_ref[...],
                   preferred_element_type=jnp.float32) + b23_ref[...]
    mulv_ref[...] = mulv                                         # lane-dense [TB, 256] f32 store

    mu_pad = mulv[:, :Z_PAD]                                     # [TB, 128], cols 20:128 == 0
    log_var_pad = mulv[:, Z_PAD:]                                # [TB, 128], cols 20:128 == 0

    # ---- reparameterize: z = mu + eps * exp(log_var / 2) (on full vregs) ----
    std = jnp.exp(log_var_pad * 0.5)
    z = mu_pad + eps_ref[...] * std                              # [TB, 128] f32

    # ---- decode: fc4 + relu (K padded to 128 with zero rows), fc5 + sigmoid ----
    h2 = jnp.dot(z.astype(jnp.bfloat16), w4_ref[...],
                 preferred_element_type=jnp.float32) + b4_ref[...]
    h2 = jnp.maximum(h2, 0.0)                                    # [TB, 512] f32

    logits = jnp.dot(h2.astype(jnp.bfloat16), w5_ref[...],
                     preferred_element_type=jnp.float32) + b5_ref[...]
    # sigmoid(x) = 0.5*(tanh(x/2)+1): single EUP transcendental per element
    xr = 0.5 * (jnp.tanh(0.5 * logits) + 1.0)
    xr_ref[...] = xr.astype(jnp.bfloat16)                        # bf16 writeback


def vae_forward(x_bf16, packed, eps, *, block_b=1024):
    """x_bf16: [B, 784] bf16 (upstream supplies bf16), eps: [B, 20] f32."""
    assert x_bf16.dtype == jnp.bfloat16
    B = x_bf16.shape[0]

    # Tile choice: keep >= 2 grid steps whenever possible so the "parallel"
    # batch axis can shard across v7x's 2 TensorCores; cap at block_b=1024
    # (fits v7x's 64 MiB VMEM with the 48 MiB limit below; v5e/v6e have 128 MiB).
    if B <= 8:
        tb = B
    elif B <= block_b:
        tb = _round_up(pl.cdiv(B, 2), 8)
    else:
        tb = block_b
    nb = pl.cdiv(B, tb)

    w1, b1, w23, b23, w4, b4, w5p, b5p = packed

    # Zero-pad eps 20 -> 128 lanes (tiny array; keeps reparameterize on full vregs).
    eps_pad = jnp.zeros((B, Z_PAD), jnp.float32).at[:, :Z_DIM].set(eps)

    def tile(shape):
        return pl.BlockSpec(shape, lambda i: (i, 0))

    def const(shape):
        return pl.BlockSpec(shape, lambda i: (0, 0))   # VMEM-resident across steps

    grid_spec = pltpu.PrefetchScalarGridSpec(
        num_scalar_prefetch=0,
        grid=(nb,),
        in_specs=[
            tile((tb, IMAGE_SIZE)),                    # x (bf16)
            const(w1.shape), const(b1.shape),
            const(w23.shape), const(b23.shape),
            const(w4.shape), const(b4.shape),
            const(w5p.shape), const(b5p.shape),
            tile((tb, Z_PAD)),                         # eps (padded to 128 lanes)
        ],
        out_specs=(
            tile((tb, PAD_OUT)),                       # padded reconstruction (bf16)
            tile((tb, MULV_PAD)),                      # fused mu || log_var (f32)
        ),
    )

    xr_pad, mulv = pl.pallas_call(
        vae_kernel,
        out_shape=(jax.ShapeDtypeStruct((B, PAD_OUT), jnp.bfloat16),
                   jax.ShapeDtypeStruct((B, MULV_PAD), jnp.float32)),
        grid_spec=grid_spec,
        compiler_params=pltpu.CompilerParams(
            dimension_semantics=("parallel",),
            vmem_limit_bytes=48 * 1024 * 1024),
    )(x_bf16, w1, b1, w23, b23, w4, b4, w5p, b5p, eps_pad)

    x_reconst = xr_pad[:, :IMAGE_SIZE]                 # bf16
    mu = mulv[:, :Z_DIM]
    log_var = mulv[:, Z_PAD:Z_PAD + Z_DIM]
    return x_reconst, mu, log_var


def init_params(key):
    """Deterministic init mirroring nn.Linear shapes (stored as [in, out], f32)."""
    def linear(key, fan_in, fan_out):
        kw, kb = jax.random.split(key)
        bound = 1.0 / jnp.sqrt(fan_in)
        w = jax.random.uniform(kw, (fan_in, fan_out), jnp.float32, -bound, bound)
        b = jax.random.uniform(kb, (1, fan_out), jnp.float32, -bound, bound)
        return w, b

    k1, k2, k3, k4, k5 = jax.random.split(key, 5)
    return dict(
        fc1=linear(k1, IMAGE_SIZE, H_DIM),
        fc2=linear(k2, H_DIM, Z_DIM),      # mu head
        fc3=linear(k3, H_DIM, Z_DIM),      # log_var head
        fc4=linear(k4, Z_DIM, H_DIM),
        fc5=linear(k5, H_DIM, IMAGE_SIZE),
    )


def pack_params(params):
    """Pad hidden 400->512 and z 20->128, fuse fc2||fc3 lane-aligned, pad fc5
    output to 896 cols; weights cast to bf16, biases stay f32."""
    w1, b1 = params["fc1"]
    w2, b2 = params["fc2"]
    w3, b3 = params["fc3"]
    w4, b4 = params["fc4"]
    w5, b5 = params["fc5"]

    # fc1: [784, 512]
    w1p = jnp.zeros((IMAGE_SIZE, H_PAD), jnp.float32).at[:, :H_DIM].set(w1)
    b1p = jnp.zeros((1, H_PAD), jnp.float32).at[:, :H_DIM].set(b1)

    # fused fc2||fc3: [512, 256]; mu at cols 0:20, log_var at cols 128:148
    w23 = jnp.zeros((H_PAD, MULV_PAD), jnp.float32)
    w23 = w23.at[:H_DIM, :Z_DIM].set(w2).at[:H_DIM, Z_PAD:Z_PAD + Z_DIM].set(w3)
    b23 = jnp.zeros((1, MULV_PAD), jnp.float32)
    b23 = b23.at[:, :Z_DIM].set(b2).at[:, Z_PAD:Z_PAD + Z_DIM].set(b3)

    # fc4: [128, 512] — contracts over the full zero-padded z
    w4p = jnp.zeros((Z_PAD, H_PAD), jnp.float32).at[:Z_DIM, :H_DIM].set(w4)
    b4p = jnp.zeros((1, H_PAD), jnp.float32).at[:, :H_DIM].set(b4)

    # fc5: [512, 896]
    w5p = jnp.zeros((H_PAD, PAD_OUT), jnp.float32).at[:H_DIM, :IMAGE_SIZE].set(w5)
    b5p = jnp.zeros((1, PAD_OUT), jnp.float32).at[:, :IMAGE_SIZE].set(b5)

    # Correctness guard: mu/log_var/x_reconst pad lanes rely on these staying 0.
    assert bool(jnp.all(w23[:, Z_DIM:Z_PAD] == 0)) and bool(jnp.all(w23[:, Z_PAD + Z_DIM:] == 0))
    assert bool(jnp.all(b23[:, Z_DIM:Z_PAD] == 0)) and bool(jnp.all(b23[:, Z_PAD + Z_DIM:] == 0))
    assert bool(jnp.all(w5p[:, IMAGE_SIZE:] == 0)) and bool(jnp.all(b5p[:, IMAGE_SIZE:] == 0))
    assert bool(jnp.all(w4p[Z_DIM:, :] == 0))

    bf16 = jnp.bfloat16
    return (w1p.astype(bf16), b1p,
            w23.astype(bf16), b23,
            w4p.astype(bf16), b4p,
            w5p.astype(bf16), b5p)


def reference_forward(params, x, eps):
    """Pure-JAX reference with the same bf16-weight / f32-accumulate recipe."""
    bf16, f32 = jnp.bfloat16, jnp.float32
    w1, b1 = params["fc1"]
    w2, b2 = params["fc2"]
    w3, b3 = params["fc3"]
    w4, b4 = params["fc4"]
    w5, b5 = params["fc5"]

    def dot(a, w):
        return jnp.dot(a.astype(bf16), w.astype(bf16), preferred_element_type=f32)

    h = jax.nn.relu(dot(x, w1) + b1)
    mu = dot(h, w2) + b2
    log_var = dot(h, w3) + b3
    z = mu + eps * jnp.exp(log_var * 0.5)
    h2 = jax.nn.relu(dot(z, w4) + b4)
    xr = jax.nn.sigmoid(dot(h2, w5) + b5)
    return xr, mu, log_var


if __name__ == "__main__":
    key = jax.random.PRNGKey(0)
    kx, keps, kp = jax.random.split(key, 3)

    B = 16
    x = jax.random.normal(kx, (B, IMAGE_SIZE), jnp.float32)
    # Kernel contract: upstream supplies x in bf16 (halves the input stream).
    x_bf = x.astype(jnp.bfloat16)
    # eps for the reparameterization trick (torch.randn_like(std)); generated
    # in plain JAX and passed into the kernel so the kernel is deterministic.
    eps = jax.random.normal(keps, (B, Z_DIM), jnp.float32)

    params = init_params(kp)
    packed = pack_params(params)

    x_reconst, mu, log_var = vae_forward(x_bf, packed, eps)
    jax.block_until_ready((x_reconst, mu, log_var))

    # Sanity check against a pure-JAX reference (bf16 matmuls + bf16 output ->
    # tolerances loosened vs. pure-f32).
    xr_ref, mu_ref, lv_ref = reference_forward(params, x_bf, eps)
    assert x_reconst.shape == (B, IMAGE_SIZE) and x_reconst.dtype == jnp.bfloat16
    assert mu.shape == (B, Z_DIM) and log_var.shape == (B, Z_DIM)
    assert jnp.allclose(mu, mu_ref, atol=2e-3, rtol=2e-3)
    assert jnp.allclose(log_var, lv_ref, atol=2e-3, rtol=2e-3)
    assert jnp.allclose(x_reconst.astype(jnp.float32), xr_ref, atol=1e-2, rtol=1e-2)

    print("KERNEL_OK")
</pallas_src>

<mosaic_0001>
module attributes {stable_mosaic.version = 11 : i64} {
  func.func @vae_kernel(%arg0: i32, %arg1: memref<8x784xbf16, #tpu.memory_space<vmem>>, %arg2: memref<784x512xbf16, #tpu.memory_space<vmem>>, %arg3: memref<1x512xf32, #tpu.memory_space<vmem>>, %arg4: memref<512x256xbf16, #tpu.memory_space<vmem>>, %arg5: memref<1x256xf32, #tpu.memory_space<vmem>>, %arg6: memref<128x512xbf16, #tpu.memory_space<vmem>>, %arg7: memref<1x512xf32, #tpu.memory_space<vmem>>, %arg8: memref<512x896xbf16, #tpu.memory_space<vmem>>, %arg9: memref<1x896xf32, #tpu.memory_space<vmem>>, %arg10: memref<8x128xf32, #tpu.memory_space<vmem>>, %arg11: memref<8x896xbf16, #tpu.memory_space<vmem>>, %arg12: memref<8x256xf32, #tpu.memory_space<vmem>>) attributes {dimension_semantics = [#tpu.dimension_semantics<parallel>], iteration_bounds = array<i64: 2>, scalar_prefetch = 0 : i64, scratch_operands = 0 : i64, tpu.core_type = #tpu.core_type<tc>, window_params = [{transform_indices = @transform_0, window_bounds = array<i64: 8, 784>}, {pipeline_mode = #tpu.pipeline_mode<synchronous>, transform_indices = @transform_1, window_bounds = array<i64: 784, 512>}, {pipeline_mode = #tpu.pipeline_mode<synchronous>, transform_indices = @transform_2, window_bounds = array<i64: 1, 512>}, {pipeline_mode = #tpu.pipeline_mode<synchronous>, transform_indices = @transform_3, window_bounds = array<i64: 512, 256>}, {pipeline_mode = #tpu.pipeline_mode<synchronous>, transform_indices = @transform_4, window_bounds = array<i64: 1, 256>}, {pipeline_mode = #tpu.pipeline_mode<synchronous>, transform_indices = @transform_5, window_bounds = array<i64: 128, 512>}, {pipeline_mode = #tpu.pipeline_mode<synchronous>, transform_indices = @transform_6, window_bounds = array<i64: 1, 512>}, {pipeline_mode = #tpu.pipeline_mode<synchronous>, transform_indices = @transform_7, window_bounds = array<i64: 512, 896>}, {pipeline_mode = #tpu.pipeline_mode<synchronous>, transform_indices = @transform_8, window_bounds = array<i64: 1, 896>}, {transform_indices = @transform_9, window_bounds = array<i64: 8, 128>}, {transform_indices = @transform_10, window_bounds = array<i64: 8, 896>}, {transform_indices = @transform_11, window_bounds = array<i64: 8, 256>}]} {
    %c0 = arith.constant 0 : index
    %c0_0 = arith.constant 0 : index
    %0 = vector.load %arg1[%c0, %c0_0] : memref<8x784xbf16, #tpu.memory_space<vmem>>, vector<8x784xbf16>
    %c0_1 = arith.constant 0 : index
    %c0_2 = arith.constant 0 : index
    %1 = vector.load %arg2[%c0_1, %c0_2] : memref<784x512xbf16, #tpu.memory_space<vmem>>, vector<784x512xbf16>
    %cst = arith.constant dense<0.000000e+00> : vector<8x512xf32>
    %2 = tpu.matmul %0, %1, %cst {dimension_numbers = #tpu.dot_dimension_numbers<[1], [0], [0], [1], [0, 0, 1, 1], [], []>} : vector<8x784xbf16>, vector<784x512xbf16>, vector<8x512xf32> -> vector<8x512xf32>
    %c0_3 = arith.constant 0 : index
    %c0_4 = arith.constant 0 : index
    %3 = vector.load %arg3[%c0_3, %c0_4] : memref<1x512xf32, #tpu.memory_space<vmem>>, vector<1x512xf32>
    %4 = vector.broadcast %3 : vector<1x512xf32> to vector<8x512xf32>
    %5 = arith.addf %2, %4 : vector<8x512xf32>
    %cst_5 = arith.constant 0.000000e+00 : f32
    %6 = vector.broadcast %cst_5 : f32 to vector<8x512xf32>
    %7 = arith.maximumf %5, %6 : vector<8x512xf32>
    %8 = arith.truncf %7 : vector<8x512xf32> to vector<8x512xbf16>
    %c0_6 = arith.constant 0 : index
    %c0_7 = arith.constant 0 : index
    %9 = vector.load %arg4[%c0_6, %c0_7] : memref<512x256xbf16, #tpu.memory_space<vmem>>, vector<512x256xbf16>
    %cst_8 = arith.constant dense<0.000000e+00> : vector<8x256xf32>
    %10 = tpu.matmul %8, %9, %cst_8 {dimension_numbers = #tpu.dot_dimension_numbers<[1], [0], [0], [1], [0, 0, 1, 1], [], []>} : vector<8x512xbf16>, vector<512x256xbf16>, vector<8x256xf32> -> vector<8x256xf32>
    %c0_9 = arith.constant 0 : index
    %c0_10 = arith.constant 0 : index
    %11 = vector.load %arg5[%c0_9, %c0_10] : memref<1x256xf32, #tpu.memory_space<vmem>>, vector<1x256xf32>
    %12 = vector.broadcast %11 : vector<1x256xf32> to vector<8x256xf32>
    %13 = arith.addf %10, %12 : vector<8x256xf32>
    %c0_11 = arith.constant 0 : index
    %c0_12 = arith.constant 0 : index
    %14 = vector.load %arg12[%c0_11, %c0_12] : memref<8x256xf32, #tpu.memory_space<vmem>>, vector<8x256xf32>
    tpu.vector_store %arg12[%c0_11, %c0_12], %13 {strides = array<i32>} : memref<8x256xf32, #tpu.memory_space<vmem>>, vector<8x256xf32>,
    %15 = vector.extract_strided_slice %13 {offsets = [0, 0], sizes = [8, 128], strides = [1, 1]} : vector<8x256xf32> to vector<8x128xf32>
    %16 = vector.extract_strided_slice %13 {offsets = [0, 128], sizes = [8, 128], strides = [1, 1]} : vector<8x256xf32> to vector<8x128xf32>
    %cst_13 = arith.constant 5.000000e-01 : f32
    %17 = vector.broadcast %cst_13 : f32 to vector<8x128xf32>
    %18 = arith.mulf %16, %17 : vector<8x128xf32>
    %19 = math.exp %18 : vector<8x128xf32>
    %c0_14 = arith.constant 0 : index
    %c0_15 = arith.constant 0 : index
    %20 = vector.load %arg10[%c0_14, %c0_15] : memref<8x128xf32, #tpu.memory_space<vmem>>, vector<8x128xf32>
    %21 = arith.mulf %20, %19 : vector<8x128xf32>
    %22 = arith.addf %15, %21 : vector<8x128xf32>
    %23 = arith.truncf %22 : vector<8x128xf32> to vector<8x128xbf16>
    %c0_16 = arith.constant 0 : index
    %c0_17 = arith.constant 0 : index
    %24 = vector.load %arg6[%c0_16, %c0_17] : memref<128x512xbf16, #tpu.memory_space<vmem>>, vector<128x512xbf16>
    %cst_18 = arith.constant dense<0.000000e+00> : vector<8x512xf32>
    %25 = tpu.matmul %23, %24, %cst_18 {dimension_numbers = #tpu.dot_dimension_numbers<[1], [0], [0], [1], [0, 0, 1, 1], [], []>} : vector<8x128xbf16>, vector<128x512xbf16>, vector<8x512xf32> -> vector<8x512xf32>
    %c0_19 = arith.constant 0 : index
    %c0_20 = arith.constant 0 : index
    %26 = vector.load %arg7[%c0_19, %c0_20] : memref<1x512xf32, #tpu.memory_space<vmem>>, vector<1x512xf32>
    %27 = vector.broadcast %26 : vector<1x512xf32> to vector<8x512xf32>
    %28 = arith.addf %25, %27 : vector<8x512xf32>
    %cst_21 = arith.constant 0.000000e+00 : f32
    %29 = vector.broadcast %cst_21 : f32 to vector<8x512xf32>
    %30 = arith.maximumf %28, %29 : vector<8x512xf32>
    %31 = arith.truncf %30 : vector<8x512xf32> to vector<8x512xbf16>
    %c0_22 = arith.constant 0 : index
    %c0_23 = arith.constant 0 : index
    %32 = vector.load %arg8[%c0_22, %c0_23] : memref<512x896xbf16, #tpu.memory_space<vmem>>, vector<512x896xbf16>
    %cst_24 = arith.constant dense<0.000000e+00> : vector<8x896xf32>
    %33 = tpu.matmul %31, %32, %cst_24 {dimension_numbers = #tpu.dot_dimension_numbers<[1], [0], [0], [1], [0, 0, 1, 1], [], []>} : vector<8x512xbf16>, vector<512x896xbf16>, vector<8x896xf32> -> vector<8x896xf32>
    %c0_25 = arith.constant 0 : index
    %c0_26 = arith.constant 0 : index
    %34 = vector.load %arg9[%c0_25, %c0_26] : memref<1x896xf32, #tpu.memory_space<vmem>>, vector<1x896xf32>
    %35 = vector.broadcast %34 : vector<1x896xf32> to vector<8x896xf32>
    %36 = arith.addf %33, %35 : vector<8x896xf32>
    %cst_27 = arith.constant 5.000000e-01 : f32
    %37 = vector.broadcast %cst_27 : f32 to vector<8x896xf32>
    %38 = arith.mulf %37, %36 : vector<8x896xf32>
    %39 = math.tanh %38 : vector<8x896xf32>
    %cst_28 = arith.constant 1.000000e+00 : f32
    %40 = vector.broadcast %cst_28 : f32 to vector<8x896xf32>
    %41 = arith.addf %39, %40 : vector<8x896xf32>
    %cst_29 = arith.constant 5.000000e-01 : f32
    %42 = vector.broadcast %cst_29 : f32 to vector<8x896xf32>
    %43 = arith.mulf %42, %41 : vector<8x896xf32>
    %44 = arith.truncf %43 : vector<8x896xf32> to vector<8x896xbf16>
    %c0_30 = arith.constant 0 : index
    %c0_31 = arith.constant 0 : index
    %45 = vector.load %arg11[%c0_30, %c0_31] : memref<8x896xbf16, #tpu.memory_space<vmem>>, vector<8x896xbf16>
    tpu.vector_store %arg11[%c0_30, %c0_31], %44 {strides = array<i32>} : memref<8x896xbf16, #tpu.memory_space<vmem>>, vector<8x896xbf16>,
    return
  }
  func.func @transform_0(%arg0: i32) -> (i32, i32) {
    %c0_i32 = arith.constant 0 : i32
    %c0_i32_0 = arith.constant 0 : i32
    return %arg0, %c0_i32 : i32, i32
  }
  func.func @transform_1(%arg0: i32) -> (i32, i32) {
    %c0_i32 = arith.constant 0 : i32
    %c0_i32_0 = arith.constant 0 : i32
    %c0_i32_1 = arith.constant 0 : i32
    return %c0_i32, %c0_i32_0 : i32, i32
  }
  func.func @transform_2(%arg0: i32) -> (i32, i32) {
    %c0_i32 = arith.constant 0 : i32
    %c0_i32_0 = arith.constant 0 : i32
    %c0_i32_1 = arith.constant 0 : i32
    return %c0_i32, %c0_i32_0 : i32, i32
  }
  func.func @transform_3(%arg0: i32) -> (i32, i32) {
    %c0_i32 = arith.constant 0 : i32
    %c0_i32_0 = arith.constant 0 : i32
    %c0_i32_1 = arith.constant 0 : i32
    return %c0_i32, %c0_i32_0 : i32, i32
  }
  func.func @transform_4(%arg0: i32) -> (i32, i32) {
    %c0_i32 = arith.constant 0 : i32
    %c0_i32_0 = arith.constant 0 : i32
    %c0_i32_1 = arith.constant 0 : i32
    return %c0_i32, %c0_i32_0 : i32, i32
  }
  func.func @transform_5(%arg0: i32) -> (i32, i32) {
    %c0_i32 = arith.constant 0 : i32
    %c0_i32_0 = arith.constant 0 : i32
    %c0_i32_1 = arith.constant 0 : i32
    return %c0_i32, %c0_i32_0 : i32, i32
  }
  func.func @transform_6(%arg0: i32) -> (i32, i32) {
    %c0_i32 = arith.constant 0 : i32
    %c0_i32_0 = arith.constant 0 : i32
    %c0_i32_1 = arith.constant 0 : i32
    return %c0_i32, %c0_i32_0 : i32, i32
  }
  func.func @transform_7(%arg0: i32) -> (i32, i32) {
    %c0_i32 = arith.constant 0 : i32
    %c0_i32_0 = arith.constant 0 : i32
    %c0_i32_1 = arith.constant 0 : i32
    return %c0_i32, %c0_i32_0 : i32, i32
  }
  func.func @transform_8(%arg0: i32) -> (i32, i32) {
    %c0_i32 = arith.constant 0 : i32
    %c0_i32_0 = arith.constant 0 : i32
    %c0_i32_1 = arith.constant 0 : i32
    return %c0_i32, %c0_i32_0 : i32, i32
  }
  func.func @transform_9(%arg0: i32) -> (i32, i32) {
    %c0_i32 = arith.constant 0 : i32
    %c0_i32_0 = arith.constant 0 : i32
    return %arg0, %c0_i32 : i32, i32
  }
  func.func @transform_10(%arg0: i32) -> (i32, i32) {
    %c0_i32 = arith.constant 0 : i32
    %c0_i32_0 = arith.constant 0 : i32
    return %arg0, %c0_i32 : i32, i32
  }
  func.func @transform_11(%arg0: i32) -> (i32, i32) {
    %c0_i32 = arith.constant 0 : i32
    %c0_i32_0 = arith.constant 0 : i32
    return %arg0, %c0_i32 : i32, i32
  }
}

</mosaic_0001>

<bundles_post_ra>
// kernel: tpu_custom_call.1
= control target key start
LH: loop header
LB: loop body
LE: loop exit
PB: predicated region body
PF: predicated region fallthrough
CT: control target
= control target key end

     0   :  { %s7292_s0 = inlined_call_operand.hbm [shape: bf16[16,784], index: 0, kind: input, shape index: {}]   ;;  %s7293_s1 = inlined_call_operand.hbm [shape: bf16[784,512], index: 1, kind: input, shape index: {}]   ;;  %s7294_s2 = inlined_call_operand.hbm [shape: f32[1,512], index: 2, kind: input, shape index: {}]   ;;  %s7295_s3 = inlined_call_operand.hbm [shape: bf16[512,256], index: 3, kind: input, shape index: {}]   ;;  %s7296_s4 = inlined_call_operand.hbm [shape: f32[1,256], index: 4, kind: input, shape index: {}]   ;;  %s7297_s5 = inlined_call_operand.hbm [shape: bf16[128,512], index: 5, kind: input, shape index: {}]   ;;  %s7298_s6 = inlined_call_operand.hbm [shape: f32[1,512], index: 6, kind: input, shape index: {}]   ;;  %s7299_s7 = inlined_call_operand.hbm [shape: bf16[512,896], index: 7, kind: input, shape index: {}]   ;;  %s7300_s8 = inlined_call_operand.hbm [shape: f32[1,896], index: 8, kind: input, shape index: {}]   ;;  %s7301_s9 = inlined_call_operand.vmem [shape: f32[16,128], index: 9, kind: input, shape index: {}]   ;;  %s7302_s10 = inlined_call_operand.hbm [shape: bf16[16,896], index: 10, kind: output, shape index: {0}]   ;;  %s7303_s11 = inlined_call_operand.hbm [shape: f32[16,256], index: 11, kind: output, shape index: {1}]  }
   0x1   :  { %7308 = sst [smem:[#allocation27_spill]] %s7293_s1 }
   0x2   :  { %7309 = sst [smem:[#allocation28_spill]] %s7294_s2 }
   0x3   :  { %7310 = sst [smem:[#allocation29_spill]] %s7295_s3 }
   0x4   :  { %7311 = sst [smem:[#allocation30_spill]] %s7296_s4 }
   0x5   :  { %7312 = sst [smem:[#allocation31_spill]] %s7297_s5 }
   0x6   :  { %7313 = sst [smem:[#allocation32_spill]] %s7298_s6 }
   0x7   :  { %17 = vsyncpa [#allocation3], 0 }
   0x8   :  { %19 = vsyncpa [#allocation3 + $0x1], 0 }
   0x9   :  { %20 = vsyncpa [#allocation6], 0 }
   0xa   :  { %21 = vsyncpa [#allocation9], 0 }
   0xb   :  { %22 = vsyncpa [#allocation12], 0 }
   0xc   :  { %23 = vsyncpa [#allocation15], 0 }
   0xd   :  { %24 = vsyncpa [#allocation4], 0 }
   0xe   :  { %26 = vsyncpa [#allocation4 + $0x1], 0 }
   0xf   :  { %27 = vsyncpa [#allocation19], 0 }
  0x10   :  { %29 = vsyncpa [#allocation19 + $0x1], 0  ;;  %s6911_s17 = smov 0   ;;  %s6913_s18 = smov 0  }
  0x11   :  { %s6915_s19 = smov 0   ;;  %s6917_s20 = smov 0  }
  0x12 LB: > { %s6833_s21 = smov [#allocation5]   ;;  %s6932_s23 = sadd.s32 4294967295, %s6831_s20   ;;  %s6831_s20 = sphi %s6917_s20, %s7344_s20   ;;  %s6827_s19 = sphi %s6915_s19, %s7343_s19   ;;  %s6823_s18 = sphi %s6913_s18, %s7342_s18   ;;  %s6819_s17 = sphi %s6911_s17, %s7341_s17  }
  0x13   : > { %s324_s22 = sshll.u32 %s6833_s21, 4  ;;  %p4954_p0 = scmp.ge.s32.totalorder %s6831_s20, 1  ;;  %s325_s22 = int_to_ptr.vmem [resolvable:$true] %s324_s22 }
  0x14   : > { %p7304_p1 = scmp.eq.s32.totalorder %s6932_s23, 0  ;;  %p312_p2 = scmp.lt.s32.totalorder %s6831_s20, 3 }
  0x15   : > { %s6834_s25 = smov [#allocation8]   ;;  %s6835_s28 = smov [#allocation11]  }
  0x16   : > { %p6937_p3 = pnand %p4954_p0, %p312_p2  ;;  %s348_s26 = sshll.u32 %s6834_s25, 4  ;;  %s6950_s26 = int_to_ptr.vmem [resolvable:$true] %s348_s26 }
  0x17   : > { %s6952_s29 = sshll.u32 %s6835_s28, 4  ;;  %s6496_s12 = scalar_lea.vmem %s325_s22, 25088  ;;  %s373_s29 = int_to_ptr.vmem [resolvable:$true] %s6952_s29 }
  0x18   : > { %s7314_s24 = scalar_select %p6937_p3, 1, 0 }
  0x19   : > { %p5602_p5 = pneg %p6937_p3  ;;  %p6497_p8 = scmp.ne.s32.totalorder %s325_s22, %s6496_s12 }
  0x1a   : > { %p6504_p11 = scmp.lt.s32.totalorder %s325_s22, %s325_s22  ;;  %p6505_p12 = scmp.lt.s32.totalorder %s6496_s12, %s6496_s12 }
  0x1b   : > { %p6946_p6 = pnand %p5602_p5, %p7304_p1 }
  0x1c   : > { %p6506_p13 = por %p6505_p12, %p6504_p11 }
  0x1d   : > { %p6956_p7 = pneg %p6946_p6 }
  0x1f   : > { %p6499_p9 = pnand %p6497_p8, %p6956_p7 }
  0x21   : > { %p6500_p10 = pneg %p6499_p9 }
  0x23   : > { %p6507_p0 = pnand %p6506_p13, %p6500_p10 }
  0x25   : > { %6510 = shalt.err (!%p6507_p0)
}
  0x26   : > { %s6836_s13 = smov 256   ;;  %s6837_s14 = smov 16  }
  0x27   : > { %s7317_s1 = sld [smem:[#allocation27_spill]]  ;;  %s6522_s21 = scalar_lea.vmem %s6950_s26, 8192 }
  0x28   : > { %p6523_p2 = scmp.ne.s32.totalorder %s6950_s26, %s6522_s21  ;;  %p6530_p9 = scmp.lt.s32.totalorder %s6950_s26, %s6950_s26 }
  0x29   : > { %p6531_p10 = scmp.lt.s32.totalorder %s6522_s21, %s6522_s21 }
  0x2a   : > { %p6525_p5 = pnand %p6523_p2, %p6956_p7 }
  0x2b   : > { %p6532_p11 = por %p6531_p10, %p6530_p9 }
  0x2c   : > { %p6526_p8 = pneg %p6525_p5 }
  0x2d   : > { %5605 = dma.hbm_to_vmem [thread:$0]  (!%p6946_p6), %s7317_s1, 25088, %s325_s22, [#allocation6], %s6836_s13, %s6836_s13, %s6837_s14  }
  0x2e   : > { %p6533_p12 = pnand %p6532_p11, %p6526_p8 }
  0x30   : > { %6536 = shalt.err (!%p6533_p12)
}
  0x31   : > { %s6838_s25 = smov 128   ;;  %s6839_s28 = smov 8  }
  0x32   : > { %s7318_s3 = sld [smem:[#allocation29_spill]]  ;;  %s6548_s15 = scalar_lea.vmem %s373_s29, 4096 }
  0x33   : > { %p6549_p13 = scmp.ne.s32.totalorder %s373_s29, %s6548_s15  ;;  %p6556_p5 = scmp.lt.s32.totalorder %s373_s29, %s373_s29 }
  0x34   : > { %p6557_p8 = scmp.lt.s32.totalorder %s6548_s15, %s6548_s15 }
  0x35   : > { %p6551_p0 = pnand %p6549_p13, %p6956_p7 }
  0x36   : > { %p6558_p9 = por %p6557_p8, %p6556_p5 }
  0x37   : > { %p6552_p2 = pneg %p6551_p0 }
  0x38   : > { %5611 = dma.hbm_to_vmem [thread:$0]  (!%p6946_p6), %s7318_s3, 8192, %s6950_s26, [#allocation9], %s6838_s25, %s6838_s25, %s6839_s28  }
  0x39   : > { %p6559_p10 = pnand %p6558_p9, %p6552_p2 }
  0x3b   : > { %6562 = shalt.err (!%p6559_p10)
}
  0x3c   : > { %s7319_s5 = sld [smem:[#allocation31_spill]]  ;;  %s6840_s12 = smov [#allocation14]  }
  0x3d   : > { %s396_s26 = sshll.u32 %s6840_s12, 4  ;;  %s397_s26 = int_to_ptr.vmem [resolvable:$true] %s396_s26 }
  0x3e   : > { %s6574_s25 = scalar_lea.vmem %s397_s26, 28672  ;;  %p6582_p0 = scmp.lt.s32.totalorder %s397_s26, %s397_s26 }
  0x3f   : > { %p6575_p11 = scmp.ne.s32.totalorder %s397_s26, %s6574_s25  ;;  %p6583_p4 = scmp.lt.s32.totalorder %s6574_s25, %s6574_s25 }
  0x41   : > { %p6577_p12 = pnand %p6575_p11, %p6956_p7  ;;  %p6584_p5 = por %p6583_p4, %p6582_p0 }
  0x42   : > { %5617 = dma.hbm_to_vmem [thread:$0]  (!%p6946_p6), %s7319_s5, 4096, %s373_s29, [#allocation12], %s6836_s13, %s6836_s13, %s6837_s14  }
  0x43   : > { %p6578_p13 = pneg %p6577_p12 }
  0x45   : > { %p6585_p2 = pnand %p6584_p5, %p6578_p13 }
  0x47   : > { %6588 = shalt.err (!%p6585_p2)
}
  0x48   : > { %s6841_s28 = smov 448   ;;  %s6842_s22 = smov 28  }
  0x49   : > { %5623 = dma.hbm_to_vmem [thread:$0]  (!%p6946_p6), %s7299_s7, 28672, %s397_s26, [#allocation15], %s6841_s28, %s6841_s28, %s6842_s22  }
  0x4a   : > { %s6843_s13 = smov [#allocation7]   ;;  %s6844_s16 = smov [#allocation10]  }
  0x4b   : > { %s338_s14 = sshll.u32 %s6843_s13, 4  ;;  %s362_s21 = sshll.u32 %s6844_s16, 4  ;;  %s339_s14 = int_to_ptr.vmem [resolvable:$true] %s338_s14  ;;  %s363_s21 = int_to_ptr.vmem [resolvable:$true] %s362_s21 }
  0x4c   : > { %s6600_s12 = scalar_lea.vmem %s339_s14, 64  ;;  %p6608_p10 = scmp.lt.s32.totalorder %s339_s14, %s339_s14 }
  0x4d   : > { %p6601_p8 = scmp.ne.s32.totalorder %s339_s14, %s6600_s12  ;;  %p6609_p11 = scmp.lt.s32.totalorder %s6600_s12, %s6600_s12 }
  0x4f   : > { %p6603_p4 = pnand %p6601_p8, %p6956_p7  ;;  %p6610_p12 = por %p6609_p11, %p6608_p10 }
  0x51   : > { %p6604_p9 = pneg %p6603_p4 }
  0x53   : > { %p6611_p13 = pnand %p6610_p12, %p6604_p9 }
  0x55   : > { %6614 = shalt.err (!%p6611_p13)
}
  0x56   : > { %s7320_s2 = sld [smem:[#allocation28_spill]]  ;;  %s6626_s28 = scalar_lea.vmem %s363_s21, 32 }
  0x57   : > { %p6627_p0 = scmp.ne.s32.totalorder %s363_s21, %s6626_s28  ;;  %p6634_p1 = scmp.lt.s32.totalorder %s363_s21, %s363_s21 }
  0x58   : > { %p6635_p8 = scmp.lt.s32.totalorder %s6626_s28, %s6626_s28 }
  0x59   : > { %p6629_p5 = pnand %p6627_p0, %p6956_p7 }
  0x5a   : > { %p6636_p4 = por %p6635_p8, %p6634_p1 }
  0x5b   : > { %p6630_p2 = pneg %p6629_p5 }
  0x5c   : > { %5608 = dma.hbm_to_vmem [thread:$0]  (!%p6946_p6), %s7320_s2, 64, %s339_s14, [#allocation6]  }
  0x5d   : > { %p6637_p3 = pnand %p6636_p4, %p6630_p2 }
  0x5f   : > { %6640 = shalt.err (!%p6637_p3)
}
  0x60   : > { %s7321_s4 = sld [smem:[#allocation30_spill]]  ;;  %s6845_s29 = smov [#allocation13]  }
  0x61   : > { %s386_s13 = sshll.u32 %s6845_s29, 4  ;;  %s6846_s14 = smov [#allocation16]   ;;  %s387_s13 = int_to_ptr.vmem [resolvable:$true] %s386_s13 }
  0x62   : > { %s410_s16 = sshll.u32 %s6846_s14, 4  ;;  %s6652_s12 = scalar_lea.vmem %s387_s13, 64  ;;  %s411_s16 = int_to_ptr.vmem [resolvable:$true] %s410_s16 }
  0x63   : > { %p6653_p9 = scmp.ne.s32.totalorder %s387_s13, %s6652_s12  ;;  %p6660_p11 = scmp.lt.s32.totalorder %s387_s13, %s387_s13 }
  0x64   : > { %p6661_p3 = scmp.lt.s32.totalorder %s6652_s12, %s6652_s12 }
  0x65   : > { %p6655_p10 = pnand %p6653_p9, %p6956_p7 }
  0x66   : > { %5614 = dma.hbm_to_vmem [thread:$0]  (!%p6946_p6), %s7321_s4, 32, %s363_s21, [#allocation9]  }
  0x67   : > { %p6656_p1 = pneg %p6655_p10  ;;  %p6662_p12 = por %p6661_p3, %p6660_p11 }
  0x69   : > { %p6663_p13 = pnand %p6662_p12, %p6656_p1 }
  0x6b   : > { %6666 = shalt.err (!%p6663_p13)
}
  0x6c   : > { %s7322_s6 = sld [smem:[#allocation32_spill]]  ;;  %s6678_s26 = scalar_lea.vmem %s411_s16, 112 }
  0x6d   : > { %p6679_p0 = scmp.ne.s32.totalorder %s411_s16, %s6678_s26  ;;  %s6685_s28 = scalar_lea.vmem %s411_s16, 128 }
  0x6e   : > { %p6686_p8 = scmp.lt.s32.totalorder %s411_s16, %s411_s16  ;;  %p6687_p4 = scmp.lt.s32.totalorder %s6685_s28, %s6678_s26 }
  0x6f   : > { %p6681_p5 = pnand %p6679_p0, %p6956_p7 }
  0x70   : > { %p6688_p9 = por %p6687_p4, %p6686_p8 }
  0x71   : > { %p6682_p2 = pneg %p6681_p5 }
  0x72   : > { %5620 = dma.hbm_to_vmem [thread:$0]  (!%p6946_p6), %s7322_s6, 64, %s387_s13, [#allocation12]  }
  0x73   : > { %p6689_p10 = pnand %p6688_p9, %p6682_p2 }
  0x75   : > { %6692 = shalt.err (!%p6689_p10)
}
  0x76   : > { %5626 = dma.hbm_to_vmem [thread:$0]  (!%p6946_p6), %s7300_s8, 112, %s411_s16, [#allocation15]  }
  0x77   : > { %s4953_s30 = sadd.s32 4294967294, %s6831_s20   ;;  %s7024_s27 = sadd.s32 1, %s6831_s20  }
  0x78   : > { %s39_s29 = ssub.s32 %s6831_s20, %s7024_s27  ;;  %s42_s13 = sadd.s32 1, %s6827_s19 }
  0x79   : > { %p40_p7 = scmp.eq.s32.totalorder %s39_s29, 0  ;;  %p49_p1 = scmp.ne.s32.totalorder %s6827_s19, %s6823_s18 }
  0x7a   : > { %p50_p11 = scmp.eq.s32.totalorder %s6831_s20, 0  ;;  %p55_p3 = scmp.ne.s32.totalorder %s6823_s18, %s6819_s17 }
  0x7b   : > { %s7035_s14 = scalar_select %p40_p7, %s6827_s19, %s42_s13  }
  0x7c   : > { %p51_p12 = por %p50_p11, %p49_p1  ;;  %p7323_p13 = scmp.eq.s32.totalorder %s6932_s23, 0 }
  0x7d   : > { %p273_p6 = scmp.eq.s32.totalorder %s6932_s23, 1  ;;  %p279_p5 = scmp.eq.s32.totalorder %s4953_s30, 1 }
  0x7e   : > { %p7039_p0 = por %p7323_p13, %p55_p3  ;;  %p5646_p2 = scmp.lt.s32.totalorder %s6831_s20, 2 }
  0x7f   : > { %s421_s16 = sand.u32 1, %s6827_s19   ;;  %p7046_p8 = por %p273_p6, %p49_p1 }
  0x80   : > { %s7324_s12 = scalar_select %p7039_p0, 1, 0 }
  0x81   : > { %s7325_s25 = scalar_select %p7046_p8, 1, 0 }
  0x82   : > { %p7050_p4 = por %p279_p5, %p55_p3  ;;  %s5560_s26 = smul.u32 28, %s421_s16 }
  0x83   : > { %s5561_s28 = smul.u32 448, %s6831_s20  ;;  %p7055_p9 = pnand %p5646_p2, %p51_p12 }
  0x84   : > { %s7326_s21 = scalar_select %p7050_p4, 1, 0 }
  0x85   : > { %s7062_s30 = scalar_lea.hbm %s7292_s0, %s5561_s28  ;;  %s425_s13 = scalar_lea.vmem [#allocation2], %s5560_s26 }
  0x86   : > { %s433_s1 = sshll.u32 %s425_s13, 4  ;;  %s422_s2 = scalar_lea.sflag [#allocation3], %s421_s16  ;;  %s434_s1 = int_to_ptr.vmem [resolvable:$true] %s433_s1 }
  0x87   : > { %s6693_s3 = scalar_lea.hbm %s7062_s30, 448  ;;  %p6695_p7 = pneg %p7055_p9 }
  0x88   : > { %p6694_p10 = scmp.ne.s32.totalorder %s7062_s30, %s6693_s3  ;;  %s6698_s15 = scalar_lea.hbm %s7292_s0, 896 }
  0x89   : > { %p6699_p3 = scmp.lt.s32.totalorder %s7062_s30, %s7292_s0  ;;  %p6700_p12 = scmp.lt.s32.totalorder %s6698_s15, %s6693_s3 }
  0x8a   : > { %p6696_p1 = pnand %p6695_p7, %p6694_p10 }
  0x8b   : > { %p6701_p13 = por %p6700_p12, %p6699_p3 }
  0x8c   : > { %p6697_p11 = pneg %p6696_p1 }
  0x8e   : > { %p6702_p6 = pnand %p6701_p13, %p6697_p11 }
  0x90   : > { %6705 = shalt.err (!%p6702_p6)
}
  0x91   : > { %s6706_s26 = scalar_lea.vmem %s434_s1, 448  ;;  %s6847_s16 = smov [#allocation2]  }
  0x92   : > { %p6707_p5 = scmp.ne.s32.totalorder %s434_s1, %s6706_s26  ;;  %s6711_s13 = sshll.u32 %s6847_s16, 4  ;;  %s6712_s13 = int_to_ptr.vmem [resolvable:$false] %s6711_s13 }
  0x93   : > { %s6713_s6 = scalar_lea.vmem %s6712_s13, 896  ;;  %p6714_p10 = scmp.lt.s32.totalorder %s434_s1, %s6712_s13 }
  0x94   : > { %p6709_p2 = pnand %p6707_p5, %p6695_p7  ;;  %p6715_p1 = scmp.lt.s32.totalorder %s6713_s6, %s6706_s26 }
  0x96   : > { %p6710_p4 = pneg %p6709_p2  ;;  %p6716_p8 = por %p6715_p1, %p6714_p10 }
  0x98   : > { %p6717_p0 = pnand %p6716_p8, %p6710_p4 }
  0x9a   : > { %6720 = shalt.err (!%p6717_p0)
}
  0x9b   : > { %5630 = dma.hbm_to_vmem [thread:$0]  (!%p7055_p9), %s7062_s30, 448, %s434_s1, %s422_s2  }
  0x9c   : > { %p7328_p11 = scmp.ne.s32.totalorder %s7314_s24, 0 }
  0x9d   : > { %s7081_s3 = sand.u32 (!%p7328_p11), 1, %s6823_s18   ;;  %p7329_p0 = scmp.ne.s32.totalorder (!%p7328_p11), %s7324_s12, 0 }
  0x9e   : > { %449 = sbr.rel (%p7328_p11) target bundleno = 1402 (0x57a), region = 60  ;;  %s452_s5 = scalar_lea.sflag (!%p7328_p11), [#allocation3], %s7081_s3 }
  0x9f   : > { %s5562_s4 = smul.u32 (!%p7328_p11), 28, %s7081_s3 }
  0xa1   : > { %s7087_s6 = scalar_lea.vmem (!%p7328_p11), [#allocation2], %s5562_s4 }
  0xa3   : > { %6790 = dma.done.wait (%p7329_p0), %s452_s5, 448  }
  0xa4   : > { %6792 = vsyncadd (%p7329_p0), %s452_s5, 4294966848  ;;  %p7330_p8 = scmp.eq.s32.totalorder %s6932_s23, 0 }
  0xa6   : > { %6794 = dma.done.wait (%p7330_p8), [#allocation6], 25152   ;;  %p7331_p4 = pmov %p7330_p8 }
  0xa8   : > { %6796 = vsyncadd (%p7331_p4), [#allocation6], 4294942144  ;;  %p7332_p9 = pmov %p7331_p4 }
  0xa9   : > { %p7333_p7 = pmov %p7331_p4 }
  0xaa   : > { %6798 = dma.done.wait (%p7332_p9), [#allocation9], 8224  }
  0xab   : > { %6800 = vsyncadd (%p7333_p7), [#allocation9], 4294959072  ;;  %p7334_p3 = pmov %p7331_p4 }
  0xad   : > { %6802 = dma.done.wait (%p7334_p3), [#allocation12], 4160   ;;  %p7335_p12 = pmov %p7334_p3 }
  0xae   : > { %p7336_p13 = pmov %p7334_p3 }
  0xaf   : > { %6804 = vsyncadd (%p7335_p12), [#allocation12], 4294963136 }
  0xb0   : > { %6806 = dma.done.wait (%p7336_p13), [#allocation15], 28784   ;;  %p7337_p6 = pmov %p7334_p3 }
  0xb1   : > { %v5703_v0 = vld [vmem:[#allocation5 + $0xe4] ss:$16 sps:$4 sm:$0xff]   ;;  %v5707_v2 = vld [vmem:[#allocation5 + $0xe0] ss:$16 sps:$4 sm:$0xff]   ;;  %vm1766_vm0 = vcmask 130048   ;;  %s4974_s1 = sshll.u32 %s7081_s3, 4 }
  0xb2   : > { %6808 = vsyncadd (%p7337_p6), [#allocation15], 4294938512  ;;  %v5705_v1 = vld [vmem:[#allocation5 + $0x2e4] ss:$16 sps:$4 sm:$0xff]   ;;  %1770 = vmatprep.subr.bf16.mxu0 %v5703_v0  ;;  %v5708_v3 = vld [vmem:[#allocation5 + $0x2e0] ss:$16 sps:$4 sm:$0xff]  }
  0xb3   : > { %1811 = vmatprep.subr.bf16.mxu1 %v5705_v1  ;;  %v5709_v4 = vld [vmem:[#allocation5 + $0xc4] ss:$16 sps:$4 sm:$0xff]   ;;  %1771 = vmatpush1.bf16.msra.mxu0 %v5707_v2  ;;  %v5713_v6 = vld [vmem:[#allocation5 + $0xc0] ss:$16 sps:$4 sm:$0xff]   ;;  %s7171_s2 = scalar_lea.vmem [#allocation18], %s4974_s1  ;;  %p535_p5 = scmp.lt.s32.totalorder %s6932_s23, 1 }
  0xb4   : > { %1812 = vmatpush1.bf16.msra.mxu1 %v5708_v3  ;;  %v5711_v5 = vld [vmem:[#allocation5 + $0x2c4] ss:$16 sps:$4 sm:$0xff]   ;;  %1772 = vmatprep.subr.bf16.mxu0 %v5709_v4  ;;  %v5714_v7 = vld [vmem:[#allocation5 + $0x2c0] ss:$16 sps:$4 sm:$0xff]   ;;  %s7216_s29 = scalar_lea.vmem [#allocation17], %s5562_s4  ;;  %s5515_s28 = sshll.u32 %s6932_s23, 8 }
  0xb5   : > { %1813 = vmatprep.subr.bf16.mxu1 %v5711_v5  ;;  %v5715_v8 = vld [vmem:[#allocation5 + $0xa4] ss:$16 sps:$4 sm:$0xff]   ;;  %v5719_v10 = vld [vmem:[#allocation5 + $0xa0] ss:$16 sps:$4 sm:$0xff]   ;;  %s536_s24 = scalar_select %p535_p5, %s6932_s23, 1 }
  0xb6   : > { %v5717_v9 = vld [vmem:[#allocation5 + $0x2a4] ss:$16 sps:$4 sm:$0xff]   ;;  %v5720_v11 = vld [vmem:[#allocation5 + $0x2a0] ss:$16 sps:$4 sm:$0xff]   ;;  %s4763_s26 = sshll.u32 %s7171_s2, 4  ;;  %s7228_s4 = scalar_lea.hbm %s7303_s11, %s5515_s28  ;;  %s4764_s26 = int_to_ptr.vmem [resolvable:$true] %s4763_s26 }
  0xb7   : > { %1773 = vmatpush1.bf16.msra.mxu0 %v5713_v6  ;;  %v5721_v12 = vld [vmem:[#allocation5 + $0x84] ss:$16 sps:$4 sm:$0xff]   ;;  %v5725_v14 = vld [vmem:[#allocation5 + $0x80] ss:$16 sps:$4 sm:$0xff]   ;;  %s4975_s12 = sshll.u32 %s536_s24, 3  ;;  %s4735_s5 = scalar_lea.sflag [#allocation19], %s7081_s3 }
  0xb8   : > { %1814 = vmatpush1.bf16.msra.mxu1 %v5714_v7  ;;  %1774 = vmatprep.subr.bf16.mxu0 %v5715_v8  ;;  %v5723_v13 = vld [vmem:[#allocation5 + $0x284] ss:$16 sps:$4 sm:$0xff]   ;;  %v5726_v15 = vld [vmem:[#allocation5 + $0x280] ss:$16 sps:$4 sm:$0xff]   ;;  %s538_s15 = scalar_lea.vmem %s7301_s9, %s4975_s12  ;;  %p7338_p10 = scmp.ne.s32.totalorder %s7325_s25, 0 }
  0xb9   : > { %1815 = vmatprep.subr.bf16.mxu1 %v5717_v9  ;;  %v5727_v16 = vld [vmem:[#allocation5 + $0x64] ss:$16 sps:$4 sm:$0xff]   ;;  %v5731_v18 = vld [vmem:[#allocation5 + $0x60] ss:$16 sps:$4 sm:$0xff]   ;;  %s6849_s1 = smov [#allocation18]  }
  0xba   : > { %v5729_v17 = vld [vmem:[#allocation5 + $0x264] ss:$16 sps:$4 sm:$0xff]   ;;  %v5732_v19 = vld [vmem:[#allocation5 + $0x260] ss:$16 sps:$4 sm:$0xff]   ;;  %s6725_s24 = sshll.u32 %s6849_s1, 4  ;;  %s6726_s24 = int_to_ptr.vmem [resolvable:$false] %s6725_s24 }
  0xbb   : > { %1775 = vmatpush1.bf16.msra.mxu0 %v5719_v10  ;;  %v5733_v20 = vld [vmem:[#allocation5 + $0x44] ss:$16 sps:$4 sm:$0xff]   ;;  %v5737_v22 = vld [vmem:[#allocation5 + $0x40] ss:$16 sps:$4 sm:$0xff]   ;;  %p6728_p0 = scmp.lt.s32.totalorder %s4764_s26, %s6726_s24 }
  0xbc   : > { %1816 = vmatpush1.bf16.msra.mxu1 %v5720_v11  ;;  %1776 = vmatprep.subr.bf16.mxu0 %v5721_v12  ;;  %v5735_v21 = vld [vmem:[#allocation5 + $0x244] ss:$16 sps:$4 sm:$0xff]   ;;  %v5738_v23 = vld [vmem:[#allocation5 + $0x240] ss:$16 sps:$4 sm:$0xff]   ;;  %v5814_v11 = vld [vmem:[#allocation5 + $0xec] ss:$16 sps:$4 sm:$0xff]  }
  0xbd   : > { %1817 = vmatprep.subr.bf16.mxu1 %v5723_v13  ;;  %v5739_v24 = vld [vmem:[#allocation5 + $0x24] ss:$16 sps:$4 sm:$0xff]   ;;  %v5743_v26 = vld [vmem:[#allocation5 + $0x20] ss:$16 sps:$4 sm:$0xff]   ;;  %v6848_v13 = vmov 0  }
  0xbe   : > { %v5741_v25 = vld [vmem:[#allocation5 + $0x224] ss:$16 sps:$4 sm:$0xff]   ;;  %v5744_v27 = vld [vmem:[#allocation5 + $0x220] ss:$16 sps:$4 sm:$0xff]  }
  0xbf   : > { %1777 = vmatpush1.bf16.msra.mxu0 %v5725_v14  ;;  %v5745_v28 = vld [vmem:[#allocation5 + $0x4] ss:$16 sps:$4 sm:$0xff]   ;;  %v5749_v30 = vld [vmem:[#allocation5] ss:$16 sps:$4 sm:$0xff]  }
  0xc0   : > { %1818 = vmatpush1.bf16.msra.mxu1 %v5726_v15  ;;  %1778 = vmatprep.subr.bf16.mxu0 %v5727_v16  ;;  %v5747_v29 = vld [vmem:[#allocation5 + $0x204] ss:$16 sps:$4 sm:$0xff]   ;;  %v5750_v31 = vld [vmem:[#allocation5 + $0x200] ss:$16 sps:$4 sm:$0xff]   ;;  %v5812_v15 = vld [vmem:[#allocation5 + $0xe8] ss:$16 sps:$4 sm:$0xff]  }
  0xc1   : > { %1819 = vmatprep.subr.bf16.mxu1 %v5729_v17  ;;  %v5751_v32 = vld [vmem:[#allocation5 + $0x1e4] ss:$16 sps:$4 sm:$0xff]   ;;  %v5755_v34 = vld [vmem:[#allocation5 + $0x1e0] ss:$16 sps:$4 sm:$0xff]  }
  0xc2   : > { %v5753_v33 = vld [vmem:[#allocation5 + $0x3e4] ss:$16 sps:$4 sm:$0xff]   ;;  %v5756_v35 = vld [vmem:[#allocation5 + $0x3e0] ss:$16 sps:$4 sm:$0xff]  }
  0xc3   : > { %1779 = vmatpush1.bf16.msra.mxu0 %v5731_v18  ;;  %v5757_v36 = vld [vmem:[#allocation5 + $0x1c4] ss:$16 sps:$4 sm:$0xff]   ;;  %v5761_v38 = vld [vmem:[#allocation5 + $0x1c0] ss:$16 sps:$4 sm:$0xff]   ;;  %v5821_v18 = vld [vmem:[#allocation5 + $0xcc] ss:$16 sps:$4 sm:$0xff]  }
  0xc4   : > { %1820 = vmatpush1.bf16.msra.mxu1 %v5732_v19  ;;  %1780 = vmatprep.subr.bf16.mxu0 %v5733_v20  ;;  %v5759_v37 = vld [vmem:[#allocation5 + $0x3c4] ss:$16 sps:$4 sm:$0xff]   ;;  %v5762_v39 = vld [vmem:[#allocation5 + $0x3c0] ss:$16 sps:$4 sm:$0xff]   ;;  %v5819_v20 = vld [vmem:[#allocation5 + $0xc8] ss:$16 sps:$4 sm:$0xff]  }
  0xc5   : > { %1821 = vmatprep.subr.bf16.mxu1 %v5735_v21  ;;  %v5763_v40 = vld [vmem:[#allocation5 + $0x1a4] ss:$16 sps:$4 sm:$0xff]   ;;  %v5767_v42 = vld [vmem:[#allocation5 + $0x1a0] ss:$16 sps:$4 sm:$0xff]  }
  0xc6   : > { %v5765_v41 = vld [vmem:[#allocation5 + $0x3a4] ss:$16 sps:$4 sm:$0xff]   ;;  %v5768_v43 = vld [vmem:[#allocation5 + $0x3a0] ss:$16 sps:$4 sm:$0xff]  }
  0xc7   : > { %1781 = vmatpush1.bf16.msra.mxu0 %v5737_v22  ;;  %v5769_v44 = vld [vmem:[#allocation5 + $0x184] ss:$16 sps:$4 sm:$0xff]   ;;  %v5773_v49 = vld [vmem:[#allocation5 + $0x180] ss:$16 sps:$4 sm:$0xff]   ;;  %v5827_v22 = vld [vmem:[#allocation5 + $0xac] ss:$16 sps:$4 sm:$0xff]  }
  0xc8   : > { %1822 = vmatpush1.bf16.msra.mxu1 %v5738_v23  ;;  %1782 = vmatprep.subr.bf16.mxu0 %v5739_v24  ;;  %v5771_v45 = vld [vmem:[#allocation5 + $0x384] ss:$16 sps:$4 sm:$0xff]   ;;  %v5774_v50 = vld [vmem:[#allocation5 + $0x380] ss:$16 sps:$4 sm:$0xff]   ;;  %v5825_v24 = vld [vmem:[#allocation5 + $0xa8] ss:$16 sps:$4 sm:$0xff]  }
  0xc9   : > { %1823 = vmatprep.subr.bf16.mxu1 %v5741_v25  ;;  %v540_v46 = vld [vmem:[%s7087_s6] sm:$0xff]  ;;  %v541_v48 = vld [vmem:[%s7087_s6 + $0x8] sm:$0xff]  ;;  %v5818_v17 = vld [vmem:[%s7087_s6 + $0x18] ss:$0 sps:$4 sm:$0xff]  }
  0xca   : > { %v7110_v47 = vcombine.high %v540_v46, %v540_v46  ;;  %v7113_v51 = vcombine.high %v541_v48, %v541_v48  ;;  %v5775_v52 = vld [vmem:[#allocation5 + $0x164] ss:$16 sps:$4 sm:$0xff]   ;;  %v5779_v54 = vld [vmem:[#allocation5 + $0x160] ss:$16 sps:$4 sm:$0xff]   ;;  %v7117_v6 = vcombine.low %v540_v46, %v540_v46  ;;  %v7119_v7 = vcombine.low %v541_v48, %v541_v48  ;;  %v5855_v46 = vld [vmem:[#allocation5 + $0x8] ss:$16 sps:$4 sm:$0xff]  }
  0xcb   : > { %1783 = vmatpush1.bf16.msra.mxu0 %v5743_v26  ;;  %v5777_v53 = vld [vmem:[#allocation5 + $0x364] ss:$16 sps:$4 sm:$0xff]   ;;  %v5780_v55 = vld [vmem:[#allocation5 + $0x360] ss:$16 sps:$4 sm:$0xff]   ;;  %v5833_v26 = vld [vmem:[#allocation5 + $0x8c] ss:$16 sps:$4 sm:$0xff]  }
  0xcc   : > { %1824 = vmatpush1.bf16.msra.mxu1 %v5744_v27  ;;  %1784 = vmatprep.subr.bf16.mxu0 %v5745_v28  ;;  %v5781_v56 = vld [vmem:[#allocation5 + $0x144] ss:$16 sps:$4 sm:$0xff]   ;;  %v5785_v58 = vld [vmem:[#allocation5 + $0x140] ss:$16 sps:$4 sm:$0xff]   ;;  %v5831_v28 = vld [vmem:[#allocation5 + $0x88] ss:$16 sps:$4 sm:$0xff]  }
  0xcd   : > { %1825 = vmatprep.subr.bf16.mxu1 %v5747_v29  ;;  %1802 = vmatprep.mubr.bf16.mxu0 %v7110_v47  ;;  %v5783_v57 = vld [vmem:[#allocation5 + $0x344] ss:$16 sps:$4 sm:$0xff]   ;;  %v5786_v59 = vld [vmem:[#allocation5 + $0x340] ss:$16 sps:$4 sm:$0xff]   ;;  %v5863_v48 = vld [vmem:[#allocation5 + $0x1ec] ss:$16 sps:$4 sm:$0xff]  }
  0xce   : > { %1843 = vmatprep.mubr.bf16.mxu1 %v7113_v51  ;;  %v5787_v60 = vld [vmem:[#allocation5 + $0x124] ss:$16 sps:$4 sm:$0xff]   ;;  %v5791_v62 = vld [vmem:[#allocation5 + $0x120] ss:$16 sps:$4 sm:$0xff]  }
  0xcf   : > { %1785 = vmatpush1.bf16.msra.mxu0 %v5749_v30  ;;  %v5789_v61 = vld [vmem:[#allocation5 + $0x324] ss:$16 sps:$4 sm:$0xff]   ;;  %v5792_v63 = vld [vmem:[#allocation5 + $0x320] ss:$16 sps:$4 sm:$0xff]   ;;  %v5839_v30 = vld [vmem:[#allocation5 + $0x6c] ss:$16 sps:$4 sm:$0xff]  }
  0xd0   : > { %1826 = vmatpush1.bf16.msra.mxu1 %v5750_v31  ;;  %1786 = vmatprep.subr.bf16.mxu0 %v5751_v32  ;;  %v5793_v0 = vld [vmem:[#allocation5 + $0x104] ss:$16 sps:$4 sm:$0xff]   ;;  %v5797_v2 = vld [vmem:[#allocation5 + $0x100] ss:$16 sps:$4 sm:$0xff]  }
  0xd1   : > { %1827 = vmatprep.subr.bf16.mxu1 %v5753_v33  ;;  %v5795_v1 = vld [vmem:[#allocation5 + $0x304] ss:$16 sps:$4 sm:$0xff]   ;;  %v5798_v3 = vld [vmem:[#allocation5 + $0x300] ss:$16 sps:$4 sm:$0xff]  }
  0xd2   : > { %v5805_v4 = vld [vmem:[#allocation5 + $0x4e4] ss:$16 sps:$4 sm:$0xff]   ;;  %v5803_v8 = vld [vmem:[#allocation5 + $0x4e0] ss:$16 sps:$4 sm:$0xff]  }
  0xd3   : > { %1787 = vmatpush2.bf16.msra.mxu0 %v5755_v34  ;;  %v5808_v5 = vld [vmem:[#allocation5 + $0x604] ss:$16 sps:$4 sm:$0xff]   ;;  %v5806_v9 = vld [vmem:[#allocation5 + $0x600] ss:$16 sps:$4 sm:$0xff]   ;;  %v5837_v34 = vld [vmem:[#allocation5 + $0x68] ss:$16 sps:$4 sm:$0xff]  }
  0xd4   : > { %1828 = vmatpush2.bf16.msra.mxu1 %v5756_v35  ;;  %1788 = vmatprep.subr.bf16.mxu0 %v5757_v36  ;;  %v5811_v10 = vld [vmem:[#allocation5 + $0x4c4] ss:$16 sps:$4 sm:$0xff]   ;;  %v5809_v12 = vld [vmem:[#allocation5 + $0x4c0] ss:$16 sps:$4 sm:$0xff]   ;;  %v5845_v36 = vld [vmem:[#allocation5 + $0x4c] ss:$16 sps:$4 sm:$0xff]  }
  0xd5   : > { %1829 = vmatprep.subr.bf16.mxu1 %v5759_v37  ;;  %v5817_v14 = vld [vmem:[#allocation5 + $0x4a4] ss:$16 sps:$4 sm:$0xff]   ;;  %v5815_v16 = vld [vmem:[#allocation5 + $0x4a0] ss:$16 sps:$4 sm:$0xff]  }
  0xd6   : > { %v5824_v19 = vld [vmem:[#allocation5 + $0x484] ss:$16 sps:$4 sm:$0xff]   ;;  %v5822_v21 = vld [vmem:[#allocation5 + $0x480] ss:$16 sps:$4 sm:$0xff]  }
  0xd7   : > { %1789 = vmatpush2.bf16.msra.mxu0 %v5761_v38  ;;  %v5830_v23 = vld [vmem:[#allocation5 + $0x464] ss:$16 sps:$4 sm:$0xff]   ;;  %v5828_v25 = vld [vmem:[#allocation5 + $0x460] ss:$16 sps:$4 sm:$0xff]   ;;  %v5843_v38 = vld [vmem:[#allocation5 + $0x48] ss:$16 sps:$4 sm:$0xff]  }
  0xd8   : > { %1830 = vmatpush2.bf16.msra.mxu1 %v5762_v39  ;;  %1790 = vmatprep.subr.bf16.mxu0 %v5763_v40  ;;  %v5836_v27 = vld [vmem:[#allocation5 + $0x444] ss:$16 sps:$4 sm:$0xff]   ;;  %v5834_v29 = vld [vmem:[#allocation5 + $0x440] ss:$16 sps:$4 sm:$0xff]   ;;  %v5851_v40 = vld [vmem:[#allocation5 + $0x2c] ss:$16 sps:$4 sm:$0xff]  }
  0xd9   : > { %1831 = vmatprep.subr.bf16.mxu1 %v5765_v41  ;;  %v5842_v31 = vld [vmem:[#allocation5 + $0x424] ss:$16 sps:$4 sm:$0xff]   ;;  %v5840_v35 = vld [vmem:[#allocation5 + $0x420] ss:$16 sps:$4 sm:$0xff]  }
  0xda   : > { %v7128_v32 = vld [vmem:[%s7087_s6 + $0x10] sm:$0xff]  ;;  %v5846_v39 = vld [vmem:[#allocation5 + $0x400] ss:$16 sps:$4 sm:$0xff]  }
  0xdb   : > { %1791 = vmatpush2.bf16.msra.mxu0 %v5767_v42  ;;  %v7132_v33 = vcombine.high %v7128_v32, %v7128_v32  ;;  %v5848_v37 = vld [vmem:[#allocation5 + $0x404] ss:$16 sps:$4 sm:$0xff]   ;;  %v5849_v42 = vld [vmem:[#allocation5 + $0x28] ss:$16 sps:$4 sm:$0xff]  }
  0xdc   : > { %1832 = vmatpush2.bf16.msra.mxu1 %v5768_v43  ;;  %1792 = vmatprep.subr.bf16.mxu0 %v5769_v44  ;;  %v5854_v41 = vld [vmem:[#allocation5 + $0x5e4] ss:$16 sps:$4 sm:$0xff]   ;;  %v5852_v43 = vld [vmem:[#allocation5 + $0x5e0] ss:$16 sps:$4 sm:$0xff]   ;;  %v5857_v44 = vld [vmem:[#allocation5 + $0xc] ss:$16 sps:$4 sm:$0xff]  }
  0xdd   : > { %1833 = vmatprep.subr.bf16.mxu1 %v5771_v45  ;;  %v5860_v45 = vld [vmem:[#allocation5 + $0x5c4] ss:$16 sps:$4 sm:$0xff]  }
  0xdf   : > { %1793 = vmatpush2.bf16.msra.mxu0 %v5773_v49  ;;  %v5866_v49 = vld [vmem:[#allocation5 + $0x5a4] ss:$16 sps:$4 sm:$0xff]  }
  0xe0   : > { %1834 = vmatpush2.bf16.msra.mxu1 %v5774_v50  ;;  %1794 = vmatprep.subr.bf16.mxu0 %v5775_v52  ;;  %v5861_v50 = vld [vmem:[#allocation5 + $0x1e8] ss:$16 sps:$4 sm:$0xff]   ;;  %v5864_v52 = vld [vmem:[#allocation5 + $0x5a0] ss:$16 sps:$4 sm:$0xff]  }
  0xe1   : > { %1835 = vmatprep.subr.bf16.mxu1 %v5777_v53  ;;  %v5869_v53 = vld [vmem:[#allocation5 + $0x1cc] ss:$16 sps:$4 sm:$0xff]  }
  0xe3   : > { %1795 = vmatpush2.bf16.msra.mxu0 %v5779_v54  ;;  %v5872_v54 = vld [vmem:[#allocation5 + $0x584] ss:$16 sps:$4 sm:$0xff]  }
  0xe4   : > { %1836 = vmatpush2.bf16.msra.mxu1 %v5780_v55  ;;  %1796 = vmatprep.subr.bf16.mxu0 %v5781_v56  ;;  %v5867_v55 = vld [vmem:[#allocation5 + $0x1c8] ss:$16 sps:$4 sm:$0xff]   ;;  %v5870_v56 = vld [vmem:[#allocation5 + $0x580] ss:$16 sps:$4 sm:$0xff]  }
  0xe5   : > { %1837 = vmatprep.subr.bf16.mxu1 %v5783_v57  ;;  %v5875_v57 = vld [vmem:[#allocation5 + $0x1ac] ss:$16 sps:$4 sm:$0xff]  }
  0xe7   : > { %1797 = vmatpush2.bf16.msra.mxu0 %v5785_v58  ;;  %v5878_v58 = vld [vmem:[#allocation5 + $0x564] ss:$16 sps:$4 sm:$0xff]  }
  0xe8   : > { %1838 = vmatpush2.bf16.msra.mxu1 %v5786_v59  ;;  %1798 = vmatprep.subr.bf16.mxu0 %v5787_v60  ;;  %v5873_v59 = vld [vmem:[#allocation5 + $0x1a8] ss:$16 sps:$4 sm:$0xff]   ;;  %v5876_v60 = vld [vmem:[#allocation5 + $0x560] ss:$16 sps:$4 sm:$0xff]  }
  0xe9   : > { %1839 = vmatprep.subr.bf16.mxu1 %v5789_v61  ;;  %v5881_v61 = vld [vmem:[#allocation5 + $0x18c] ss:$16 sps:$4 sm:$0xff]  }
  0xeb   : > { %1799 = vmatpush2.bf16.msra.mxu0 %v5791_v62  ;;  %v5884_v62 = vld [vmem:[#allocation5 + $0x544] ss:$16 sps:$4 sm:$0xff]  }
  0xec   : > { %1840 = vmatpush2.bf16.msra.mxu1 %v5792_v63  ;;  %1800 = vmatprep.subr.bf16.mxu0 %v5793_v0  ;;  %v5879_v63 = vld [vmem:[#allocation5 + $0x188] ss:$16 sps:$4 sm:$0xff]   ;;  %v5882_v0 = vld [vmem:[#allocation5 + $0x540] ss:$16 sps:$4 sm:$0xff]  }
  0xed   : > { %1841 = vmatprep.subr.bf16.mxu1 %v5795_v1  ;;  %v5887_v1 = vld [vmem:[#allocation5 + $0x16c] ss:$16 sps:$4 sm:$0xff]  }
  0xef   : > { %1801 = vmatpush2.bf16.msra.mxu0 %v5797_v2  ;;  %v5890_v2 = vld [vmem:[#allocation5 + $0x524] ss:$16 sps:$4 sm:$0xff]  }
  0xf0   : > { %1842 = vmatpush2.bf16.msra.mxu1 %v5798_v3  ;;  %1852 = vmatprep.subr.bf16.mxu0 %v5805_v4  ;;  %v5885_v3 = vld [vmem:[#allocation5 + $0x168] ss:$16 sps:$4 sm:$0xff]   ;;  %v5888_v4 = vld [vmem:[#allocation5 + $0x520] ss:$16 sps:$4 sm:$0xff]  }
  0xf1   : > { %1907 = vmatprep.subr.bf16.mxu1 %v5808_v5  ;;  %v5893_v5 = vld [vmem:[#allocation5 + $0x14c] ss:$16 sps:$4 sm:$0xff]  }
  0xf2   : > { %1803 = vmatmul.mubr.bf16.vlgmr.msra.gmra.mxu0 %v7117_v6 }
  0xf3   : > { %1844 = vmatmul.mubr.bf16.vlgmr.msra.gmra.mxu1 %v7119_v7  ;;  %1853 = vmatpush1.bf16.msra.mxu0 %v5803_v8  ;;  %v5896_v8 = vld [vmem:[#allocation5 + $0x504] ss:$16 sps:$4 sm:$0xff]  }
  0xf4   : > { %1908 = vmatpush1.bf16.msra.mxu1 %v5806_v9  ;;  %1854 = vmatprep.subr.bf16.mxu0 %v5811_v10  ;;  %v5891_v9 = vld [vmem:[#allocation5 + $0x148] ss:$16 sps:$4 sm:$0xff]   ;;  %v5894_v10 = vld [vmem:[#allocation5 + $0x500] ss:$16 sps:$4 sm:$0xff]  }
  0xf5   : > { %1925 = vmatprep.mubr.bf16.mxu1 %v6848_v13  ;;  %1934 = vmatprep.subr.bf16.mxu1 %v5814_v11  ;;  %v5901_v11 = vld [vmem:[#allocation5 + $0x12c] ss:$16 sps:$4 sm:$0xff]  }
  0xf6   : > { %1884 = vmatprep.mubr.bf16.mxu0 %v7132_v33 }
  0xf7   : > { %1855 = vmatpush1.bf16.msra.mxu0 %v5809_v12  ;;  %v5904_v12 = vld [vmem:[#allocation5 + $0x2ec] ss:$16 sps:$4 sm:$0xff]  }
  0xf8   : > { %1856 = vmatprep.subr.bf16.mxu0 %v5817_v14  ;;  %v7137_v14 = vcombine.low %v7128_v32, %v7128_v32  ;;  %v5931_v32 = vld [vmem:[#allocation5 + $0x48c] ss:$16 sps:$4 sm:$0xff]  }
  0xfb   : > { %5179 = vmatmul.mubr.msk.bf16.vlgmr.msra.gmra.mxu1 %vm1766_vm0, %v5818_v17  ;;  %1857 = vmatpush1.bf16.msra.mxu0 %v5815_v16  ;;  %v5902_v16 = vld [vmem:[#allocation5 + $0x2e8] ss:$16 sps:$4 sm:$0xff]   ;;  %v5907_v17 = vld [vmem:[#allocation5 + $0x10c] ss:$16 sps:$4 sm:$0xff]  }
  0xfc   : > { %1935 = vmatpush1.bf16.msra.mxu1 %v5812_v15  ;;  %1858 = vmatprep.subr.bf16.mxu0 %v5824_v19  ;;  %v5899_v15 = vld [vmem:[#allocation5 + $0x128] ss:$16 sps:$4 sm:$0xff]  }
  0xfd   : > { %1936 = vmatprep.subr.bf16.mxu1 %v5821_v18  ;;  %1966 = vmatprep.mubr.bf16.mxu1 %v7110_v47  ;;  %v5858_v47 = vld [vmem:[#allocation5 + $0x5c0] ss:$16 sps:$4 sm:$0xff]   ;;  %v5910_v18 = vld [vmem:[#allocation5 + $0x2cc] ss:$16 sps:$4 sm:$0xff]   ;;  %v5905_v19 = vld [vmem:[#allocation5 + $0x108] ss:$16 sps:$4 sm:$0xff]  }
  0xff   : > { %1859 = vmatpush1.bf16.msra.mxu0 %v5822_v21  ;;  %v5913_v21 = vld [vmem:[#allocation5 + $0x4ec] ss:$16 sps:$4 sm:$0xff]  }
 0x100   : > { %1937 = vmatpush1.bf16.msra.mxu1 %v5819_v20  ;;  %1860 = vmatprep.subr.bf16.mxu0 %v5830_v23  ;;  %v5908_v20 = vld [vmem:[#allocation5 + $0x2c8] ss:$16 sps:$4 sm:$0xff]  }
 0x101   : > { %1938 = vmatprep.subr.bf16.mxu1 %v5827_v22  ;;  %v5916_v22 = vld [vmem:[#allocation5 + $0x2ac] ss:$16 sps:$4 sm:$0xff]   ;;  %v5911_v23 = vld [vmem:[#allocation5 + $0x4e8] ss:$16 sps:$4 sm:$0xff]  }
 0x103   : > { %1861 = vmatpush1.bf16.msra.mxu0 %v5828_v25  ;;  %v5919_v25 = vld [vmem:[#allocation5 + $0x4cc] ss:$16 sps:$4 sm:$0xff]  }
 0x104   : > { %1939 = vmatpush1.bf16.msra.mxu1 %v5825_v24  ;;  %1862 = vmatprep.subr.bf16.mxu0 %v5836_v27  ;;  %v5914_v24 = vld [vmem:[#allocation5 + $0x2a8] ss:$16 sps:$4 sm:$0xff]  }
 0x105   : > { %1940 = vmatprep.subr.bf16.mxu1 %v5833_v26  ;;  %v5922_v26 = vld [vmem:[#allocation5 + $0x28c] ss:$16 sps:$4 sm:$0xff]   ;;  %v5917_v27 = vld [vmem:[#allocation5 + $0x4c8] ss:$16 sps:$4 sm:$0xff]  }
 0x107   : > { %1863 = vmatpush1.bf16.msra.mxu0 %v5834_v29  ;;  %v5925_v29 = vld [vmem:[#allocation5 + $0x4ac] ss:$16 sps:$4 sm:$0xff]  }
 0x108   : > { %1941 = vmatpush1.bf16.msra.mxu1 %v5831_v28  ;;  %1864 = vmatprep.subr.bf16.mxu0 %v5842_v31  ;;  %v5920_v28 = vld [vmem:[#allocation5 + $0x288] ss:$16 sps:$4 sm:$0xff]  }
 0x109   : > { %1942 = vmatprep.subr.bf16.mxu1 %v5839_v30  ;;  %v5928_v30 = vld [vmem:[#allocation5 + $0x26c] ss:$16 sps:$4 sm:$0xff]   ;;  %v5923_v31 = vld [vmem:[#allocation5 + $0x4a8] ss:$16 sps:$4 sm:$0xff]  }
 0x10b   : > { %1865 = vmatpush1.bf16.msra.mxu0 %v5840_v35  ;;  %v5929_v35 = vld [vmem:[#allocation5 + $0x488] ss:$16 sps:$4 sm:$0xff]  }
 0x10c   : > { %1943 = vmatpush1.bf16.msra.mxu1 %v5837_v34  ;;  %1866 = vmatprep.subr.bf16.mxu0 %v5848_v37  ;;  %v5934_v34 = vld [vmem:[#allocation5 + $0x24c] ss:$16 sps:$4 sm:$0xff]  }
 0x10d   : > { %1944 = vmatprep.subr.bf16.mxu1 %v5845_v36  ;;  %v5937_v36 = vld [vmem:[#allocation5 + $0x46c] ss:$16 sps:$4 sm:$0xff]  }
 0x10e   : > { %v5940_v37 = vld [vmem:[#allocation5 + $0x22c] ss:$16 sps:$4 sm:$0xff]  }
 0x10f   : > { %1867 = vmatpush1.bf16.msra.mxu0 %v5846_v39  ;;  %v5938_v39 = vld [vmem:[#allocation5 + $0x228] ss:$16 sps:$4 sm:$0xff]  }
 0x110   : > { %1945 = vmatpush1.bf16.msra.mxu1 %v5843_v38  ;;  %1868 = vmatprep.subr.bf16.mxu0 %v5854_v41  ;;  %v5935_v38 = vld [vmem:[#allocation5 + $0x468] ss:$16 sps:$4 sm:$0xff]  }
 0x111   : > { %1946 = vmatprep.subr.bf16.mxu1 %v5851_v40  ;;  %v5946_v40 = vld [vmem:[#allocation5 + $0x20c] ss:$16 sps:$4 sm:$0xff]   ;;  %v5941_v41 = vld [vmem:[#allocation5 + $0x448] ss:$16 sps:$4 sm:$0xff]  }
 0x113   : > { %1869 = vmatpush2.bf16.msra.mxu0 %v5852_v43  ;;  %v5949_v43 = vld [vmem:[#allocation5 + $0x42c] ss:$16 sps:$4 sm:$0xff]  }
 0x114   : > { %1947 = vmatpush1.bf16.msra.mxu1 %v5849_v42  ;;  %1870 = vmatprep.subr.bf16.mxu0 %v5860_v45  ;;  %v5944_v42 = vld [vmem:[#allocation5 + $0x208] ss:$16 sps:$4 sm:$0xff]  }
 0x115   : > { %1948 = vmatprep.subr.bf16.mxu1 %v5857_v44  ;;  %v5952_v44 = vld [vmem:[#allocation5 + $0x3ec] ss:$16 sps:$4 sm:$0xff]   ;;  %v5947_v45 = vld [vmem:[#allocation5 + $0x428] ss:$16 sps:$4 sm:$0xff]  }
 0x117   : > { %1871 = vmatpush2.bf16.msra.mxu0 %v5858_v47  ;;  %v5955_v47 = vld [vmem:[#allocation5 + $0x40c] ss:$16 sps:$4 sm:$0xff]  }
 0x118   : > { %1949 = vmatpush1.bf16.msra.mxu1 %v5855_v46  ;;  %1872 = vmatprep.subr.bf16.mxu0 %v5866_v49  ;;  %v5950_v46 = vld [vmem:[#allocation5 + $0x3e8] ss:$16 sps:$4 sm:$0xff]  }
 0x119   : > { %1950 = vmatprep.subr.bf16.mxu1 %v5863_v48  ;;  %v5958_v48 = vld [vmem:[#allocation5 + $0x3cc] ss:$16 sps:$4 sm:$0xff]   ;;  %v5953_v49 = vld [vmem:[#allocation5 + $0x408] ss:$16 sps:$4 sm:$0xff]  }
 0x11b   : > { %1873 = vmatpush2.bf16.msra.mxu0 %v5864_v52  ;;  %v5961_v52 = vld [vmem:[#allocation5 + $0x5ec] ss:$16 sps:$4 sm:$0xff]  }
 0x11c   : > { %1951 = vmatpush2.bf16.msra.mxu1 %v5861_v50  ;;  %1874 = vmatprep.subr.bf16.mxu0 %v5872_v54  ;;  %v5956_v50 = vld [vmem:[#allocation5 + $0x3c8] ss:$16 sps:$4 sm:$0xff]  }
 0x11d   : > { %1952 = vmatprep.subr.bf16.mxu1 %v5869_v53  ;;  %v5964_v53 = vld [vmem:[#allocation5 + $0x3ac] ss:$16 sps:$4 sm:$0xff]   ;;  %v5959_v54 = vld [vmem:[#allocation5 + $0x5e8] ss:$16 sps:$4 sm:$0xff]  }
 0x11f   : > { %1875 = vmatpush2.bf16.msra.mxu0 %v5870_v56  ;;  %v5967_v56 = vld [vmem:[#allocation5 + $0x5cc] ss:$16 sps:$4 sm:$0xff]  }
 0x120   : > { %1953 = vmatpush2.bf16.msra.mxu1 %v5867_v55  ;;  %1876 = vmatprep.subr.bf16.mxu0 %v5878_v58  ;;  %v5962_v55 = vld [vmem:[#allocation5 + $0x3a8] ss:$16 sps:$4 sm:$0xff]  }
 0x121   : > { %1954 = vmatprep.subr.bf16.mxu1 %v5875_v57  ;;  %v5970_v57 = vld [vmem:[#allocation5 + $0x38c] ss:$16 sps:$4 sm:$0xff]   ;;  %v5965_v58 = vld [vmem:[#allocation5 + $0x5c8] ss:$16 sps:$4 sm:$0xff]  }
 0x123   : > { %1877 = vmatpush2.bf16.msra.mxu0 %v5876_v60  ;;  %v5973_v60 = vld [vmem:[#allocation5 + $0x5ac] ss:$16 sps:$4 sm:$0xff]  }
 0x124   : > { %1955 = vmatpush2.bf16.msra.mxu1 %v5873_v59  ;;  %1878 = vmatprep.subr.bf16.mxu0 %v5884_v62  ;;  %v5968_v59 = vld [vmem:[#allocation5 + $0x388] ss:$16 sps:$4 sm:$0xff]  }
 0x125   : > { %1956 = vmatprep.subr.bf16.mxu1 %v5881_v61  ;;  %v5976_v61 = vld [vmem:[#allocation5 + $0x36c] ss:$16 sps:$4 sm:$0xff]   ;;  %v5971_v62 = vld [vmem:[#allocation5 + $0x5a8] ss:$16 sps:$4 sm:$0xff]  }
 0x127   : > { %1879 = vmatpush2.bf16.msra.mxu0 %v5882_v0  ;;  %v5979_v0 = vld [vmem:[#allocation5 + $0x58c] ss:$16 sps:$4 sm:$0xff]  }
 0x128   : > { %1957 = vmatpush2.bf16.msra.mxu1 %v5879_v63  ;;  %1880 = vmatprep.subr.bf16.mxu0 %v5890_v2  ;;  %v5974_v63 = vld [vmem:[#allocation5 + $0x368] ss:$16 sps:$4 sm:$0xff]  }
 0x129   : > { %1958 = vmatprep.subr.bf16.mxu1 %v5887_v1  ;;  %v5982_v1 = vld [vmem:[#allocation5 + $0x34c] ss:$16 sps:$4 sm:$0xff]   ;;  %v5977_v2 = vld [vmem:[#allocation5 + $0x588] ss:$16 sps:$4 sm:$0xff]  }
 0x12b   : > { %1881 = vmatpush2.bf16.msra.mxu0 %v5888_v4  ;;  %v5985_v4 = vld [vmem:[#allocation5 + $0x56c] ss:$16 sps:$4 sm:$0xff]  }
 0x12c   : > { %1959 = vmatpush2.bf16.msra.mxu1 %v5885_v3  ;;  %1882 = vmatprep.subr.bf16.mxu0 %v5896_v8  ;;  %v5980_v3 = vld [vmem:[#allocation5 + $0x348] ss:$16 sps:$4 sm:$0xff]  }
 0x12d   : > { %1960 = vmatprep.subr.bf16.mxu1 %v5893_v5  ;;  %v5988_v5 = vld [vmem:[#allocation5 + $0x32c] ss:$16 sps:$4 sm:$0xff]   ;;  %v5983_v8 = vld [vmem:[#allocation5 + $0x568] ss:$16 sps:$4 sm:$0xff]  }
 0x12f   : > { %1883 = vmatpush2.bf16.msra.mxu0 %v5894_v10  ;;  %v5991_v10 = vld [vmem:[#allocation5 + $0x54c] ss:$16 sps:$4 sm:$0xff]  }
 0x130   : > { %1961 = vmatpush2.bf16.msra.mxu1 %v5891_v9  ;;  %1975 = vmatprep.subr.bf16.mxu0 %v5904_v12  ;;  %v5986_v9 = vld [vmem:[#allocation5 + $0x328] ss:$16 sps:$4 sm:$0xff]  }
 0x131   : > { %1962 = vmatprep.subr.bf16.mxu1 %v5901_v11  ;;  %v5994_v11 = vld [vmem:[#allocation5 + $0x30c] ss:$16 sps:$4 sm:$0xff]   ;;  %v5989_v12 = vld [vmem:[#allocation5 + $0x548] ss:$16 sps:$4 sm:$0xff]  }
 0x132   : > { %1885 = vmatmul.mubr.bf16.vlgmr.msra.gmra.mxu0 %v7137_v14 }
 0x133   : > { %1976 = vmatpush1.bf16.msra.mxu0 %v5902_v16  ;;  %2007 = vmatprep.mubr.bf16.mxu0 %v7113_v51  ;;  %v5926_v51 = vld [vmem:[#allocation5 + $0x268] ss:$16 sps:$4 sm:$0xff]   ;;  %v5997_v16 = vld [vmem:[#allocation5 + $0x52c] ss:$16 sps:$4 sm:$0xff]  }
 0x134   : > { %1963 = vmatpush2.bf16.msra.mxu1 %v5899_v15  ;;  %1977 = vmatprep.subr.bf16.mxu0 %v5910_v18  ;;  %v5992_v15 = vld [vmem:[#allocation5 + $0x308] ss:$16 sps:$4 sm:$0xff]  }
 0x135   : > { %1964 = vmatprep.subr.bf16.mxu1 %v5907_v17  ;;  %v6000_v17 = vld [vmem:[#allocation5 + $0x60c] ss:$16 sps:$4 sm:$0xff]   ;;  %v5995_v18 = vld [vmem:[#allocation5 + $0x528] ss:$16 sps:$4 sm:$0xff]  }
 0x137   : > { %1978 = vmatpush1.bf16.msra.mxu0 %v5908_v20  ;;  %v6003_v20 = vld [vmem:[#allocation5 + $0x50c] ss:$16 sps:$4 sm:$0xff]  }
 0x138   : > { %1965 = vmatpush2.bf16.msra.mxu1 %v5905_v19  ;;  %1979 = vmatprep.subr.bf16.mxu0 %v5916_v22  ;;  %v5998_v19 = vld [vmem:[#allocation5 + $0x608] ss:$16 sps:$4 sm:$0xff]  }
 0x139   : > { %2016 = vmatprep.subr.bf16.mxu1 %v5913_v21  ;;  %v6006_v21 = vld [vmem:[#allocation8 + $0x74] ss:$8 sps:$4 sm:$0xff]  }
 0x13a   : > { %v6001_v22 = vld [vmem:[#allocation5 + $0x508] ss:$16 sps:$4 sm:$0xff]  }
 0x13b   : > { %1967 = vmatmul.mubr.bf16.vlgmr.msra.gmra.mxu1 %v7117_v6  ;;  %1980 = vmatpush1.bf16.msra.mxu0 %v5914_v24  ;;  %v5932_v6 = vld [vmem:[#allocation5 + $0x248] ss:$16 sps:$4 sm:$0xff]  }
 0x13c   : > { %2017 = vmatpush1.bf16.msra.mxu1 %v5911_v23  ;;  %1981 = vmatprep.subr.bf16.mxu0 %v5922_v26  ;;  %v6004_v23 = vld [vmem:[#allocation8 + $0x70] ss:$8 sps:$4 sm:$0xff]   ;;  %v6009_v24 = vld [vmem:[#allocation8 + $0x64] ss:$8 sps:$4 sm:$0xff]  }
 0x13d   : > { %2018 = vmatprep.subr.bf16.mxu1 %v5919_v25  ;;  %2048 = vmatprep.mubr.bf16.mxu1 %v7132_v33  ;;  %v5943_v33 = vld [vmem:[#allocation5 + $0x44c] ss:$16 sps:$4 sm:$0xff]  }
 0x13e   : > { %v6007_v25 = vld [vmem:[#allocation8 + $0x60] ss:$8 sps:$4 sm:$0xff]   ;;  %v6484_v26 = vld [vmem:[%s7087_s6 + $0x18] ss:$0 sps:$4 sm:$0xff]   ;;  %s6721_s6 = scalar_lea.vmem %s4764_s26, 256 }
 0x13f   : > { %1982 = vmatpush1.bf16.msra.mxu0 %v5920_v28  ;;  %v6015_v28 = vld [vmem:[#allocation8 + $0x44] ss:$8 sps:$4 sm:$0xff]   ;;  %p6722_p2 = scmp.ne.s32.totalorder %s4764_s26, %s6721_s6 }
 0x140   : > { %2019 = vmatpush1.bf16.msra.mxu1 %v5917_v27  ;;  %1983 = vmatprep.subr.bf16.mxu0 %v5928_v30  ;;  %v6012_v27 = vld [vmem:[#allocation8 + $0x54] ss:$8 sps:$4 sm:$0xff]  }
 0x141   : > { %2020 = vmatprep.subr.bf16.mxu1 %v5925_v29  ;;  %v6052_v29 = vld [vmem:[#allocation8 + $0x170] ss:$8 sps:$4 sm:$0xff]   ;;  %v6054_v30 = vld [vmem:[#allocation8 + $0x174] ss:$8 sps:$4 sm:$0xff]   ;;  %p6723_p1 = pnand %p6722_p2, %p7338_p10 }
 0x143   : > { %1984 = vmatpush1.bf16.msra.mxu0 %v5926_v51  ;;  %v6013_v51 = vld [vmem:[#allocation8 + $0x40] ss:$8 sps:$4 sm:$0xff]   ;;  %p6724_p11 = pneg %p6723_p1 }
 0x144   : > { %2021 = vmatpush1.bf16.msra.mxu1 %v5923_v31  ;;  %1985 = vmatprep.subr.bf16.mxu0 %v5934_v34  ;;  %v6057_v31 = vld [vmem:[#allocation8 + $0x164] ss:$8 sps:$4 sm:$0xff]   ;;  %v6060_v34 = vld [vmem:[#allocation8 + $0x154] ss:$8 sps:$4 sm:$0xff]  }
 0x145   : > { %2022 = vmatprep.subr.bf16.mxu1 %v5931_v32  ;;  %v6055_v32 = vld [vmem:[#allocation8 + $0x160] ss:$8 sps:$4 sm:$0xff]  }
 0x147   : > { %1986 = vmatpush1.bf16.msra.mxu0 %v5932_v6  ;;  %v6021_v6 = vld [vmem:[#allocation8 + $0x24] ss:$8 sps:$4 sm:$0xff]  }
 0x148   : > { %2023 = vmatpush1.bf16.msra.mxu1 %v5929_v35  ;;  %1987 = vmatprep.subr.bf16.mxu0 %v5940_v37  ;;  %v6016_v35 = vld [vmem:[#allocation8 + $0x30] ss:$8 sps:$4 sm:$0xff]   ;;  %v6063_v37 = vld [vmem:[#allocation8 + $0x144] ss:$8 sps:$4 sm:$0xff]  }
 0x149   : > { %2024 = vmatprep.subr.bf16.mxu1 %v5937_v36  ;;  %v6058_v36 = vld [vmem:[#allocation8 + $0x150] ss:$8 sps:$4 sm:$0xff]  }
 0x14b   : > { %1988 = vmatpush1.bf16.msra.mxu0 %v5938_v39  ;;  %v6061_v39 = vld [vmem:[#allocation8 + $0x140] ss:$8 sps:$4 sm:$0xff]  }
 0x14c   : > { %2025 = vmatpush1.bf16.msra.mxu1 %v5935_v38  ;;  %1989 = vmatprep.subr.bf16.mxu0 %v5946_v40  ;;  %v6019_v38 = vld [vmem:[#allocation8 + $0x20] ss:$8 sps:$4 sm:$0xff]   ;;  %v6066_v40 = vld [vmem:[#allocation8 + $0x134] ss:$8 sps:$4 sm:$0xff]  }
 0x14d   : > { %2026 = vmatprep.subr.bf16.mxu1 %v5943_v33  ;;  %v6024_v33 = vld [vmem:[#allocation8 + $0x14] ss:$8 sps:$4 sm:$0xff]  }
 0x14f   : > { %1990 = vmatpush1.bf16.msra.mxu0 %v5944_v42  ;;  %v6064_v42 = vld [vmem:[#allocation8 + $0x130] ss:$8 sps:$4 sm:$0xff]  }
 0x150   : > { %2027 = vmatpush1.bf16.msra.mxu1 %v5941_v41  ;;  %1991 = vmatprep.subr.bf16.mxu0 %v5952_v44  ;;  %v6022_v41 = vld [vmem:[#allocation8 + $0x10] ss:$8 sps:$4 sm:$0xff]   ;;  %v6069_v44 = vld [vmem:[#allocation8 + $0x124] ss:$8 sps:$4 sm:$0xff]  }
 0x151   : > { %2028 = vmatprep.subr.bf16.mxu1 %v5949_v43  ;;  %v6027_v43 = vld [vmem:[#allocation8 + $0x4] ss:$8 sps:$4 sm:$0xff]  }
 0x153   : > { %1992 = vmatpush2.bf16.msra.mxu0 %v5950_v46  ;;  %v6067_v46 = vld [vmem:[#allocation8 + $0x120] ss:$8 sps:$4 sm:$0xff]  }
 0x154   : > { %2029 = vmatpush1.bf16.msra.mxu1 %v5947_v45  ;;  %1993 = vmatprep.subr.bf16.mxu0 %v5958_v48  ;;  %v6025_v45 = vld [vmem:[#allocation8] ss:$8 sps:$4 sm:$0xff]   ;;  %v6072_v48 = vld [vmem:[#allocation8 + $0x114] ss:$8 sps:$4 sm:$0xff]  }
 0x155   : > { %2030 = vmatprep.subr.bf16.mxu1 %v5955_v47  ;;  %v6030_v47 = vld [vmem:[#allocation8 + $0xf4] ss:$8 sps:$4 sm:$0xff]  }
 0x157   : > { %1994 = vmatpush2.bf16.msra.mxu0 %v5956_v50  ;;  %v6070_v50 = vld [vmem:[#allocation8 + $0x110] ss:$8 sps:$4 sm:$0xff]  }
 0x158   : > { %2031 = vmatpush1.bf16.msra.mxu1 %v5953_v49  ;;  %1995 = vmatprep.subr.bf16.mxu0 %v5964_v53  ;;  %v6028_v49 = vld [vmem:[#allocation8 + $0xf0] ss:$8 sps:$4 sm:$0xff]   ;;  %v6075_v53 = vld [vmem:[#allocation8 + $0x104] ss:$8 sps:$4 sm:$0xff]  }
 0x159   : > { %2032 = vmatprep.subr.bf16.mxu1 %v5961_v52  ;;  %v6033_v52 = vld [vmem:[#allocation8 + $0xe4] ss:$8 sps:$4 sm:$0xff]  }
 0x15b   : > { %1996 = vmatpush2.bf16.msra.mxu0 %v5962_v55  ;;  %v6073_v55 = vld [vmem:[#allocation8 + $0x100] ss:$8 sps:$4 sm:$0xff]  }
 0x15c   : > { %2033 = vmatpush2.bf16.msra.mxu1 %v5959_v54  ;;  %1997 = vmatprep.subr.bf16.mxu0 %v5970_v57  ;;  %v6031_v54 = vld [vmem:[#allocation8 + $0xe0] ss:$8 sps:$4 sm:$0xff]   ;;  %v6078_v57 = vld [vmem:[#allocation8 + $0x1f4] ss:$8 sps:$4 sm:$0xff]  }
 0x15d   : > { %2034 = vmatprep.subr.bf16.mxu1 %v5967_v56  ;;  %v6036_v56 = vld [vmem:[#allocation8 + $0xd4] ss:$8 sps:$4 sm:$0xff]  }
 0x15f   : > { %1998 = vmatpush2.bf16.msra.mxu0 %v5968_v59  ;;  %v6076_v59 = vld [vmem:[#allocation8 + $0x1f0] ss:$8 sps:$4 sm:$0xff]  }
 0x160   : > { %2035 = vmatpush2.bf16.msra.mxu1 %v5965_v58  ;;  %1999 = vmatprep.subr.bf16.mxu0 %v5976_v61  ;;  %v6034_v58 = vld [vmem:[#allocation8 + $0xd0] ss:$8 sps:$4 sm:$0xff]   ;;  %v6081_v61 = vld [vmem:[#allocation8 + $0x1e4] ss:$8 sps:$4 sm:$0xff]  }
 0x161   : > { %2036 = vmatprep.subr.bf16.mxu1 %v5973_v60  ;;  %v6039_v60 = vld [vmem:[#allocation8 + $0xc4] ss:$8 sps:$4 sm:$0xff]  }
 0x163   : > { %2000 = vmatpush2.bf16.msra.mxu0 %v5974_v63  ;;  %v6079_v63 = vld [vmem:[#allocation8 + $0x1e0] ss:$8 sps:$4 sm:$0xff]  }
 0x164   : > { %2037 = vmatpush2.bf16.msra.mxu1 %v5971_v62  ;;  %2001 = vmatprep.subr.bf16.mxu0 %v5982_v1  ;;  %v6037_v62 = vld [vmem:[#allocation8 + $0xc0] ss:$8 sps:$4 sm:$0xff]   ;;  %v6084_v1 = vld [vmem:[#allocation8 + $0x1d4] ss:$8 sps:$4 sm:$0xff]  }
 0x165   : > { %2038 = vmatprep.subr.bf16.mxu1 %v5979_v0  ;;  %v6042_v0 = vld [vmem:[#allocation8 + $0xb4] ss:$8 sps:$4 sm:$0xff]  }
 0x167   : > { %2002 = vmatpush2.bf16.msra.mxu0 %v5980_v3  ;;  %v6082_v3 = vld [vmem:[#allocation8 + $0x1d0] ss:$8 sps:$4 sm:$0xff]  }
 0x168   : > { %2039 = vmatpush2.bf16.msra.mxu1 %v5977_v2  ;;  %2003 = vmatprep.subr.bf16.mxu0 %v5988_v5  ;;  %v6040_v2 = vld [vmem:[#allocation8 + $0xb0] ss:$8 sps:$4 sm:$0xff]   ;;  %v6087_v5 = vld [vmem:[#allocation8 + $0x1c4] ss:$8 sps:$4 sm:$0xff]  }
 0x169   : > { %2040 = vmatprep.subr.bf16.mxu1 %v5985_v4  ;;  %v6045_v4 = vld [vmem:[#allocation8 + $0xa4] ss:$8 sps:$4 sm:$0xff]  }
 0x16b   : > { %2004 = vmatpush2.bf16.msra.mxu0 %v5986_v9  ;;  %v6085_v9 = vld [vmem:[#allocation8 + $0x1c0] ss:$8 sps:$4 sm:$0xff]  }
 0x16c   : > { %2041 = vmatpush2.bf16.msra.mxu1 %v5983_v8  ;;  %2005 = vmatprep.subr.bf16.mxu0 %v5994_v11  ;;  %v6043_v8 = vld [vmem:[#allocation8 + $0xa0] ss:$8 sps:$4 sm:$0xff]   ;;  %v6046_v11 = vld [vmem:[#allocation8 + $0x90] ss:$8 sps:$4 sm:$0xff]  }
 0x16d   : > { %2042 = vmatprep.subr.bf16.mxu1 %v5991_v10  ;;  %v6048_v10 = vld [vmem:[#allocation8 + $0x94] ss:$8 sps:$4 sm:$0xff]  }
 0x16f   : > { %2006 = vmatpush2.bf16.msra.mxu0 %v5992_v15  ;;  %v6049_v15 = vld [vmem:[#allocation8 + $0x80] ss:$8 sps:$4 sm:$0xff]  }
 0x170   : > { %2043 = vmatpush2.bf16.msra.mxu1 %v5989_v12  ;;  %2071 = vmatprep.subr.bf16.mxu0 %v6000_v17  ;;  %v6051_v12 = vld [vmem:[#allocation8 + $0x84] ss:$8 sps:$4 sm:$0xff]  }
 0x171   : > { %2044 = vmatprep.subr.bf16.mxu1 %v5997_v16 }
 0x172   : > { %2008 = vmatmul.mubr.bf16.vlgmr.msra.gmra.mxu0 %v7119_v7  ;;  %v6010_v7 = vld [vmem:[#allocation8 + $0x50] ss:$8 sps:$4 sm:$0xff]  }
 0x173   : > { %2072 = vmatpush1.bf16.msra.mxu0 %v5998_v19  ;;  %2089 = vmatprep.mubr.bf16.mxu0 %v6848_v13 }
 0x174   : > { %2045 = vmatpush2.bf16.msra.mxu1 %v5995_v18  ;;  %2502 = vmatprep.subr.bf16.mxu0 %v6006_v21  ;;  %v6088_v21 = vld [vmem:[#allocation8 + $0x1b0] ss:$8 sps:$4 sm:$0xff]  }
 0x175   : > { %2046 = vmatprep.subr.bf16.mxu1 %v6003_v20  ;;  %v6090_v20 = vld [vmem:[#allocation8 + $0x1b4] ss:$8 sps:$4 sm:$0xff]  }
 0x178   : > { %2047 = vmatpush2.bf16.msra.mxu1 %v6001_v22 }
 0x179   : > { %2543 = vmatprep.subr.bf16.mxu1 %v6054_v30  ;;  %v6094_v30 = vld [vmem:[#allocation8 + $0x190] ss:$8 sps:$4 sm:$0xff]  }
 0x17a   : > { %5180 = vmatmul.mubr.msk.bf16.vlgmr.msra.gmra.mxu0 %vm1766_vm0, %v6484_v26  ;;  %v6093_v26 = vld [vmem:[#allocation8 + $0x1a4] ss:$8 sps:$4 sm:$0xff]  }
 0x17b   : > { %2049 = vmatmul.mubr.bf16.vlgmr.msra.gmra.mxu1 %v7137_v14  ;;  %2503 = vmatpush1.bf16.msra.mxu0 %v6004_v23  ;;  %v6018_v14 = vld [vmem:[#allocation8 + $0x34] ss:$8 sps:$4 sm:$0xff]  }
 0x17c   : > { %2504 = vmatprep.subr.bf16.mxu0 %v6009_v24  ;;  %2544 = vmatpush1.bf16.msra.mxu1 %v6052_v29  ;;  %v6096_v29 = vld [vmem:[#allocation8 + $0x194] ss:$8 sps:$4 sm:$0xff]  }
 0x17d   : > { %2545 = vmatprep.subr.bf16.mxu1 %v6057_v31 }
 0x17f   : > { %2505 = vmatpush1.bf16.msra.mxu0 %v6007_v25 }
 0x180   : > { %2506 = vmatprep.subr.bf16.mxu0 %v6012_v27  ;;  %2546 = vmatpush1.bf16.msra.mxu1 %v6055_v32  ;;  %v6091_v27 = vld [vmem:[#allocation8 + $0x1a0] ss:$8 sps:$4 sm:$0xff]   ;;  %v6099_v32 = vld [vmem:[#allocation8 + $0x184] ss:$8 sps:$4 sm:$0xff]  }
 0x181   : > { %2547 = vmatprep.subr.bf16.mxu1 %v6060_v34  ;;  %v742_v34 = vlaneseq }
 0x183   : > { %2507 = vmatpush1.bf16.msra.mxu0 %v6010_v7 }
 0x184   : > { %2508 = vmatprep.subr.bf16.mxu0 %v6015_v28  ;;  %2548 = vmatpush1.bf16.msra.mxu1 %v6058_v36  ;;  %v740_v36 = vld [vmem:[#allocation7] sm:$0xf] }
 0x185   : > { %2549 = vmatprep.subr.bf16.mxu1 %v6063_v37 }
 0x187   : > { %2509 = vmatpush1.bf16.msra.mxu0 %v6013_v51 }
 0x188   : > { %2510 = vmatprep.subr.bf16.mxu0 %v6018_v14  ;;  %2550 = vmatpush1.bf16.msra.mxu1 %v6061_v39  ;;  %v6097_v14 = vld [vmem:[#allocation8 + $0x180] ss:$8 sps:$4 sm:$0xff]  }
 0x189   : > { %2551 = vmatprep.subr.bf16.mxu1 %v6066_v40 }
 0x18b   : > { %2511 = vmatpush1.bf16.msra.mxu0 %v6016_v35  ;;  %v7148_v35 = vshrl.u32 %v742_v34, 7  ;;  %v6114_v34 = vld [vmem:[#allocation11 + $0xa4] ss:$16 sps:$4 sm:$0xff]  }
 0x18c   : > { %2512 = vmatprep.subr.bf16.mxu0 %v6021_v6  ;;  %2552 = vmatpush1.bf16.msra.mxu1 %v6064_v42 }
 0x18d   : > { %2553 = vmatprep.subr.bf16.mxu1 %v6069_v44  ;;  %v7151_v6 = vsub.s32 0, %v7148_v35  ;;  %v7154_v37 = vsub.s32 1, %v7148_v35 }
 0x18f   : > { %2513 = vmatpush1.bf16.msra.mxu0 %v6019_v38  ;;  %v745_v38 = vrot.slane %v740_v36, %v7151_v6  ;;  %v749_v39 = vrot.slane %v740_v36, %v7154_v37 }
 0x190   : > { %2514 = vmatprep.subr.bf16.mxu0 %v6024_v33  ;;  %2554 = vmatpush1.bf16.msra.mxu1 %v6067_v46 }
 0x191   : > { %2555 = vmatprep.subr.bf16.mxu1 %v6072_v48 }
 0x193   : > { %2515 = vmatpush1.bf16.msra.mxu0 %v6022_v41 }
 0x194   : > { %2516 = vmatprep.subr.bf16.mxu0 %v6027_v43  ;;  %2556 = vmatpush1.bf16.msra.mxu1 %v6070_v50 }
 0x195   : > { %2557 = vmatprep.subr.bf16.mxu1 %v6075_v53 }
 0x197   : > { %2517 = vmatpush1.bf16.msra.mxu0 %v6025_v45 }
 0x198   : > { %2518 = vmatprep.subr.bf16.mxu0 %v6030_v47  ;;  %2558 = vmatpush1.bf16.msra.mxu1 %v6073_v55 }
 0x199   : > { %2559 = vmatprep.subr.bf16.mxu1 %v6078_v57 }
 0x19b   : > { %2519 = vmatpush2.bf16.msra.mxu0 %v6028_v49 }
 0x19c   : > { %2520 = vmatprep.subr.bf16.mxu0 %v6033_v52  ;;  %2560 = vmatpush2.bf16.msra.mxu1 %v6076_v59 }
 0x19d   : > { %2561 = vmatprep.subr.bf16.mxu1 %v6081_v61  ;;  %v7163_v61 = vsub.s32 3, %v7148_v35 }
 0x19f   : > { %2521 = vmatpush2.bf16.msra.mxu0 %v6031_v54 }
 0x1a0   : > { %2522 = vmatprep.subr.bf16.mxu0 %v6036_v56  ;;  %2562 = vmatpush2.bf16.msra.mxu1 %v6079_v63 }
 0x1a1   : > { %2563 = vmatprep.subr.bf16.mxu1 %v6084_v1  ;;  %v757_v1 = vrot.slane %v740_v36, %v7163_v61 }
 0x1a3   : > { %2523 = vmatpush2.bf16.msra.mxu0 %v6034_v58 }
 0x1a4   : > { %2524 = vmatprep.subr.bf16.mxu0 %v6039_v60  ;;  %2564 = vmatpush2.bf16.msra.mxu1 %v6082_v3  ;;  %v7160_v60 = vsub.s32 2, %v7148_v35 }
 0x1a5   : > { %2565 = vmatprep.subr.bf16.mxu1 %v6087_v5 }
 0x1a6   : > { %v753_v63 = vrot.slane %v740_v36, %v7160_v60  ;;  %v6117_v36 = vld [vmem:[#allocation11 + $0xac] ss:$16 sps:$4 sm:$0xff]  }
 0x1a7   : > { %2525 = vmatpush2.bf16.msra.mxu0 %v6037_v62 }
 0x1a8   : > { %2526 = vmatprep.subr.bf16.mxu0 %v6042_v0  ;;  %2566 = vmatpush2.bf16.msra.mxu1 %v6085_v9 }
 0x1a9   : > { %2567 = vmatprep.subr.bf16.mxu1 %v6090_v20 }
 0x1ab   : > { %2527 = vmatpush2.bf16.msra.mxu0 %v6040_v2 }
 0x1ac   : > { %2528 = vmatprep.subr.bf16.mxu0 %v6045_v4  ;;  %2568 = vmatpush2.bf16.msra.mxu1 %v6088_v21 }
 0x1ad   : > { %2569 = vmatprep.subr.bf16.mxu1 %v6093_v26 }
 0x1af   : > { %2529 = vmatpush2.bf16.msra.mxu0 %v6043_v8 }
 0x1b0   : > { %2530 = vmatprep.subr.bf16.mxu0 %v6048_v10  ;;  %2570 = vmatpush2.bf16.msra.mxu1 %v6091_v27 }
 0x1b1   : > { %2571 = vmatprep.subr.bf16.mxu1 %v6096_v29  ;;  %v6103_v29 = vld [vmem:[#allocation11 + $0xe8] ss:$16 sps:$4 sm:$0xff]  }
 0x1b2   : > { %v1804_v16 = vpop.f32.mrf.mxu0 }
 0x1b3   : > { %v1845_v17 = vpop.f32.mrf.mxu1  ;;  %2531 = vmatpush2.bf16.msra.mxu0 %v6046_v11  ;;  %v1805_v33 = vadd.f32 %v1804_v16, %v745_v38  ;;  %v6112_v38 = vld [vmem:[#allocation11 + $0xa0] ss:$16 sps:$4 sm:$0xff]  }
 0x1b4   : > { %v1806_v18 = vpop.f32.mrf.mxu0  ;;  %2532 = vmatprep.subr.bf16.mxu0 %v6051_v12  ;;  %2572 = vmatpush2.bf16.msra.mxu1 %v6094_v30  ;;  %v6105_v30 = vld [vmem:[#allocation11 + $0xec] ss:$16 sps:$4 sm:$0xff]  }
 0x1b5   : > { %v1847_v19 = vpop.f32.mrf.mxu1  ;;  %2573 = vmatprep.subr.bf16.mxu1 %v6099_v32  ;;  %v1807_v40 = vadd.f32 %v1806_v18, %v749_v39  ;;  %v1846_v41 = vadd.f32 %v1845_v17, %v1805_v33  ;;  %v6106_v32 = vld [vmem:[#allocation11 + $0xc0] ss:$16 sps:$4 sm:$0xff]   ;;  %v6115_v39 = vld [vmem:[#allocation11 + $0xa8] ss:$16 sps:$4 sm:$0xff]   ;;  %v6120_v33 = vld [vmem:[#allocation11 + $0x84] ss:$16 sps:$4 sm:$0xff]  }
 0x1b6   : > { %v1808_v22 = vpop.f32.mrf.mxu0 }
 0x1b7   : > { %v1849_v23 = vpop.f32.mrf.mxu1  ;;  %2533 = vmatpush2.bf16.msra.mxu0 %v6049_v15  ;;  %v1848_v43 = vadd.f32 %v1847_v19, %v1807_v40  ;;  %v6123_v40 = vld [vmem:[#allocation11 + $0x8c] ss:$16 sps:$4 sm:$0xff]  }
 0x1b8   : > { %v1809_v24 = vpop.f32.mrf.mxu0  ;;  %2574 = vmatpush2.bf16.msra.mxu1 %v6097_v14  ;;  %v6109_v14 = vld [vmem:[#allocation11 + $0xc8] ss:$16 sps:$4 sm:$0xff]  }
 0x1b9   : > { %v1850_v25 = vpop.f32.mrf.mxu1  ;;  %2848 = vmatprep.subr.bf16.mxu1 %v6105_v30  ;;  %v6162_v30 = vld [vmem:[#allocation14 + $0x11c] ss:$28 sps:$4 sm:$0xff]  }
 0x1bb   : > { %v1927_v7 = vpop.f32.mrf.mxu1 }
 0x1bd   : > { %v1929_v28 = vpop.f32.mrf.mxu1 }
 0x1bf   : > { %v1931_v31 = vpop.f32.mrf.mxu1 }
 0x1c0   : > { %v6108_v31 = vld [vmem:[#allocation11 + $0xc4] ss:$16 sps:$4 sm:$0xff]  }
 0x1c1   : > { %v1932_v51 = vpop.f32.mrf.mxu1 }
 0x1c2   : > { %v6111_v51 = vld [vmem:[#allocation11 + $0xcc] ss:$16 sps:$4 sm:$0xff]  }
 0x1f2   : > { %v1886_v42 = vpop.f32.mrf.mxu0 }
 0x1f3   : > { %v1887_v44 = vadd.f32 %v1886_v42, %v1846_v41  ;;  %v6118_v41 = vld [vmem:[#allocation11 + $0x80] ss:$16 sps:$4 sm:$0xff]   ;;  %v6126_v42 = vld [vmem:[#allocation11 + $0x64] ss:$16 sps:$4 sm:$0xff]  }
 0x1f4   : > { %v1888_v45 = vpop.f32.mrf.mxu0 }
 0x1f5   : > { %v1928_v46 = vadd.f32 %v1927_v7, %v1887_v44  ;;  %v1889_v47 = vadd.f32 %v1888_v45, %v1848_v43  ;;  %v6100_v7 = vld [vmem:[#allocation11 + $0xe0] ss:$16 sps:$4 sm:$0xff]   ;;  %v6127_v44 = vld [vmem:[#allocation11 + $0x68] ss:$16 sps:$4 sm:$0xff]   ;;  %v6129_v45 = vld [vmem:[#allocation11 + $0x6c] ss:$16 sps:$4 sm:$0xff]  }
 0x1f6   : > { %v1890_v48 = vpop.f32.mrf.mxu0  ;;  %v6124_v43 = vld [vmem:[#allocation11 + $0x60] ss:$16 sps:$4 sm:$0xff]  }
 0x1f7   : > { %v1930_v49 = vadd.f32 %v1929_v28, %v1889_v47  ;;  %v2098_v50 = vmax.f32 %v1928_v46, 0.0  ;;  %v6102_v28 = vld [vmem:[#allocation11 + $0xe4] ss:$16 sps:$4 sm:$0xff]   ;;  %v6135_v47 = vld [vmem:[#allocation11 + $0x4c] ss:$16 sps:$4 sm:$0xff]  }
 0x1f8   : > { %v1891_v52 = vpop.f32.mrf.mxu0  ;;  %2807 = vmatprep.subr.bf16.mxu0 %v6102_v28  ;;  %v6132_v46 = vld [vmem:[#allocation11 + $0x44] ss:$16 sps:$4 sm:$0xff]   ;;  %v6130_v48 = vld [vmem:[#allocation11 + $0x40] ss:$16 sps:$4 sm:$0xff]  }
 0x1f9   : > { %v2099_v53 = vmax.f32 %v1930_v49, 0.0  ;;  %v2102_v56 = vpack.c.bf16 %v2098_v50, %v2098_v50  ;;  %v6133_v49 = vld [vmem:[#allocation11 + $0x48] ss:$16 sps:$4 sm:$0xff]   ;;  %v6138_v50 = vld [vmem:[#allocation11 + $0x24] ss:$16 sps:$4 sm:$0xff]  }
 0x1fa   : > { %v6141_v52 = vld [vmem:[#allocation11 + $0x2c] ss:$16 sps:$4 sm:$0xff]   ;;  %v6154_v28 = vld [vmem:[#allocation14 + $0x150] ss:$28 sps:$4 sm:$0xff]  }
 0x1fb   : > { %v1968_v54 = vpop.f32.mrf.mxu1  ;;  %v2103_v55 = vpack.c.bf16 %v2099_v53, %v2099_v53  ;;  %v6136_v53 = vld [vmem:[#allocation11 + $0x20] ss:$16 sps:$4 sm:$0xff]  }
 0x1fc   : > { %v1969_v3 = vadd.f32 %v1968_v54, %v753_v63  ;;  %v6139_v54 = vld [vmem:[#allocation11 + $0x28] ss:$16 sps:$4 sm:$0xff]  }
 0x1fd   : > { %v1970_v57 = vpop.f32.mrf.mxu1  ;;  %2534 = vmatprep.mubr.bf16.mxu0 %v2103_v55  ;;  %v6144_v55 = vld [vmem:[#allocation11 + $0x4] ss:$16 sps:$4 sm:$0xff]  }
 0x1fe   : > { %2535 = vmatmul.mubr.bf16.vlgmr.msra.gmra.mxu0 %v2102_v56  ;;  %v1971_v5 = vadd.f32 %v1970_v57, %v757_v1  ;;  %v6147_v56 = vld [vmem:[#allocation11 + $0xc] ss:$16 sps:$4 sm:$0xff]   ;;  %v6142_v57 = vld [vmem:[#allocation11] ss:$16 sps:$4 sm:$0xff]  }
 0x1ff   : > { %v1972_v58 = vpop.f32.mrf.mxu1  ;;  %2839 = vmatprep.mubr.bf16.mxu0 %v6848_v13  ;;  %2808 = vmatpush1.bf16.msra.mxu0 %v6100_v7  ;;  %v6159_v7 = vld [vmem:[#allocation14 + $0x4d4] ss:$28 sps:$4 sm:$0xff]  }
 0x200   : > { %2809 = vmatprep.subr.bf16.mxu0 %v6108_v31  ;;  %v6145_v58 = vld [vmem:[#allocation11 + $0x8] ss:$16 sps:$4 sm:$0xff]   ;;  %v6165_v31 = vld [vmem:[#allocation14 + $0x49c] ss:$28 sps:$4 sm:$0xff]  }
 0x201   : > { %v1973_v59 = vpop.f32.mrf.mxu1 }
 0x202   : > { %v6150_v59 = vld [vmem:[#allocation14 + $0x18c] ss:$28 sps:$4 sm:$0xff]  }
 0x203   : > { %2810 = vmatpush1.bf16.msra.mxu0 %v6106_v32  ;;  %v6163_v32 = vld [vmem:[#allocation14 + $0x498] ss:$28 sps:$4 sm:$0xff]  }
 0x204   : > { %2811 = vmatprep.subr.bf16.mxu0 %v6114_v34  ;;  %v6171_v34 = vld [vmem:[#allocation14 + $0x464] ss:$28 sps:$4 sm:$0xff]  }
 0x207   : > { %2812 = vmatpush1.bf16.msra.mxu0 %v6112_v38  ;;  %v6169_v38 = vld [vmem:[#allocation14 + $0x460] ss:$28 sps:$4 sm:$0xff]  }
 0x208   : > { %2813 = vmatprep.subr.bf16.mxu0 %v6120_v33  ;;  %v6177_v33 = vld [vmem:[#allocation14 + $0x42c] ss:$28 sps:$4 sm:$0xff]  }
 0x20b   : > { %2814 = vmatpush1.bf16.msra.mxu0 %v6118_v41  ;;  %v6175_v41 = vld [vmem:[#allocation14 + $0x428] ss:$28 sps:$4 sm:$0xff]  }
 0x20c   : > { %2815 = vmatprep.subr.bf16.mxu0 %v6126_v42  ;;  %v6183_v42 = vld [vmem:[#allocation14 + $0x3f4] ss:$28 sps:$4 sm:$0xff]  }
 0x20f   : > { %2816 = vmatpush1.bf16.msra.mxu0 %v6124_v43  ;;  %v6178_v43 = vld [vmem:[#allocation14 + $0x70] ss:$28 sps:$4 sm:$0xff]  }
 0x210   : > { %2817 = vmatprep.subr.bf16.mxu0 %v6132_v46  ;;  %v6189_v46 = vld [vmem:[#allocation14 + $0x3bc] ss:$28 sps:$4 sm:$0xff]  }
 0x213   : > { %2818 = vmatpush1.bf16.msra.mxu0 %v6130_v48  ;;  %v6187_v48 = vld [vmem:[#allocation14 + $0x3b8] ss:$28 sps:$4 sm:$0xff]  }
 0x214   : > { %2819 = vmatprep.subr.bf16.mxu0 %v6138_v50  ;;  %v6195_v50 = vld [vmem:[#allocation14 + $0x384] ss:$28 sps:$4 sm:$0xff]  }
 0x217   : > { %2820 = vmatpush1.bf16.msra.mxu0 %v6136_v53  ;;  %v6193_v53 = vld [vmem:[#allocation14 + $0x380] ss:$28 sps:$4 sm:$0xff]  }
 0x218   : > { %2821 = vmatprep.subr.bf16.mxu0 %v6144_v55  ;;  %v6201_v55 = vld [vmem:[#allocation14 + $0x6cc] ss:$28 sps:$4 sm:$0xff]  }
 0x21b   : > { %2822 = vmatpush1.bf16.msra.mxu0 %v6142_v57  ;;  %v6199_v57 = vld [vmem:[#allocation14 + $0x6c8] ss:$28 sps:$4 sm:$0xff]  }
 0x21c   : > { %4342 = vmatprep.subr.bf16.mxu0 %v6150_v59  ;;  %v6207_v59 = vld [vmem:[#allocation14 + $0x694] ss:$28 sps:$4 sm:$0xff]  }
 0x232   : > { %v2009_v62 = vpop.f32.mrf.mxu0 }
 0x233   : > { %v2010_v8 = vadd.f32 %v2009_v62, %v1969_v3  ;;  %v6153_v62 = vld [vmem:[#allocation14 + $0x50c] ss:$28 sps:$4 sm:$0xff]   ;;  %v2170_v3 = vld [vmem:[#allocation10] sm:$0x3] }
 0x234   : > { %v2011_v0 = vpop.f32.mrf.mxu0 }
 0x235   : > { %v2012_v11 = vadd.f32 %v2011_v0, %v1971_v5  ;;  %v2179_v5 = vrot.slane %v2170_v3, %v7154_v37 }
 0x236   : > { %v2013_v2 = vpop.f32.mrf.mxu0 }
 0x238   : > { %v2014_v4 = vpop.f32.mrf.mxu0 }
 0x239   : > { %v2175_v4 = vrot.slane %v2170_v3, %v7151_v6  ;;  %v6211_v3 = vld [vmem:[#allocation14 + $0x658] ss:$28 sps:$4 sm:$0xff]  }
 0x23a   : > { %v2091_v10 = vpop.f32.mrf.mxu0 }
 0x23b   : > { %v2050_v9 = vpop.f32.mrf.mxu1 }
 0x23c   : > { %v2051_v12 = vadd.f32 %v2050_v9, %v2010_v8  ;;  %v2093_v16 = vpop.f32.mrf.mxu0 }
 0x23d   : > { %v2052_v15 = vpop.f32.mrf.mxu1 }
 0x23e   : > { %v2092_v17 = vadd.f32 %v2091_v10, %v2051_v12  ;;  %v2053_v18 = vadd.f32 %v2052_v15, %v2012_v11  ;;  %v2095_v20 = vpop.f32.mrf.mxu0 }
 0x23f   : > { %v2054_v19 = vpop.f32.mrf.mxu1  ;;  %v2589_v20 = vld [vmem:[%s538_s15] sm:$0xff] }
 0x240   : > { %v2094_v21 = vadd.f32 %v2093_v16, %v2053_v18  ;;  %v2100_v22 = vmax.f32 %v2092_v17, 0.0  ;;  %v2096_v24 = vpop.f32.mrf.mxu0 }
 0x241   : > { %v2055_v23 = vpop.f32.mrf.mxu1  ;;  %v6148_v24 = vld [vmem:[#allocation14 + $0x188] ss:$28 sps:$4 sm:$0xff]  }
 0x242   : > { %v2101_v25 = vmax.f32 %v2094_v21, 0.0  ;;  %v2104_v27 = vpack.c.bf16 %v2100_v22, %v2100_v22 }
 0x244   : > { %v2105_v26 = vpack.c.bf16 %v2101_v25, %v2101_v25  ;;  %v6151_v25 = vld [vmem:[#allocation14 + $0x508] ss:$28 sps:$4 sm:$0xff]  }
 0x246   : > { %2575 = vmatprep.mubr.bf16.mxu1 %v2105_v26 }
 0x247   : > { %2576 = vmatmul.mubr.bf16.vlgmr.msra.gmra.mxu1 %v2104_v27  ;;  %v6156_v27 = vld [vmem:[#allocation14 + $0x154] ss:$28 sps:$4 sm:$0xff]  }
 0x248   : > { %2849 = vmatpush1.bf16.msra.mxu1 %v6103_v29  ;;  %2880 = vmatprep.mubr.bf16.mxu1 %v6848_v13  ;;  %v6121_v13 = vld [vmem:[#allocation11 + $0x88] ss:$16 sps:$4 sm:$0xff]   ;;  %v6157_v29 = vld [vmem:[#allocation14 + $0x4d0] ss:$28 sps:$4 sm:$0xff]  }
 0x249   : > { %2850 = vmatprep.subr.bf16.mxu1 %v6111_v51  ;;  %v6160_v51 = vld [vmem:[#allocation14 + $0x118] ss:$28 sps:$4 sm:$0xff]  }
 0x24c   : > { %2851 = vmatpush1.bf16.msra.mxu1 %v6109_v14  ;;  %v6168_v14 = vld [vmem:[#allocation14 + $0xe4] ss:$28 sps:$4 sm:$0xff]  }
 0x24d   : > { %2852 = vmatprep.subr.bf16.mxu1 %v6117_v36  ;;  %v6166_v36 = vld [vmem:[#allocation14 + $0xe0] ss:$28 sps:$4 sm:$0xff]  }
 0x250   : > { %2853 = vmatpush1.bf16.msra.mxu1 %v6115_v39  ;;  %v6174_v39 = vld [vmem:[#allocation14 + $0xac] ss:$28 sps:$4 sm:$0xff]  }
 0x251   : > { %2854 = vmatprep.subr.bf16.mxu1 %v6123_v40  ;;  %v6172_v40 = vld [vmem:[#allocation14 + $0xa8] ss:$28 sps:$4 sm:$0xff]  }
 0x254   : > { %2855 = vmatpush1.bf16.msra.mxu1 %v6121_v13  ;;  %v6180_v13 = vld [vmem:[#allocation14 + $0x74] ss:$28 sps:$4 sm:$0xff]  }
 0x255   : > { %2856 = vmatprep.subr.bf16.mxu1 %v6129_v45  ;;  %v6186_v45 = vld [vmem:[#allocation14 + $0x3c] ss:$28 sps:$4 sm:$0xff]  }
 0x258   : > { %2857 = vmatpush1.bf16.msra.mxu1 %v6127_v44  ;;  %v6181_v44 = vld [vmem:[#allocation14 + $0x3f0] ss:$28 sps:$4 sm:$0xff]  }
 0x259   : > { %2858 = vmatprep.subr.bf16.mxu1 %v6135_v47  ;;  %v6184_v47 = vld [vmem:[#allocation14 + $0x38] ss:$28 sps:$4 sm:$0xff]  }
 0x25c   : > { %2859 = vmatpush1.bf16.msra.mxu1 %v6133_v49  ;;  %v6192_v49 = vld [vmem:[#allocation14 + $0x4] ss:$28 sps:$4 sm:$0xff]  }
 0x25d   : > { %2860 = vmatprep.subr.bf16.mxu1 %v6141_v52  ;;  %v6190_v52 = vld [vmem:[#allocation14] ss:$28 sps:$4 sm:$0xff]  }
 0x260   : > { %2861 = vmatpush1.bf16.msra.mxu1 %v6139_v54  ;;  %v6198_v54 = vld [vmem:[#allocation14 + $0x34c] ss:$28 sps:$4 sm:$0xff]  }
 0x261   : > { %2862 = vmatprep.subr.bf16.mxu1 %v6147_v56  ;;  %v6196_v56 = vld [vmem:[#allocation14 + $0x348] ss:$28 sps:$4 sm:$0xff]  }
 0x264   : > { %2863 = vmatpush1.bf16.msra.mxu1 %v6145_v58  ;;  %v6204_v58 = vld [vmem:[#allocation14 + $0x314] ss:$28 sps:$4 sm:$0xff]  }
 0x265   : > { %4383 = vmatprep.subr.bf16.mxu1 %v6153_v62  ;;  %v6202_v62 = vld [vmem:[#allocation14 + $0x310] ss:$28 sps:$4 sm:$0xff]  }
 0x2be   : > { %v2536_v63 = vpop.f32.mrf.mxu0 }
 0x2bf   : > { %v2537_v8 = vadd.f32 %v2536_v63, %v2175_v4  ;;  %v6205_v63 = vld [vmem:[#allocation14 + $0x690] ss:$28 sps:$4 sm:$0xff]   ;;  %v6216_v4 = vld [vmem:[#allocation14 + $0x2a4] ss:$28 sps:$4 sm:$0xff]  }
 0x2c0   : > { %v2538_v0 = vpop.f32.mrf.mxu0 }
 0x2c1   : > { %v2539_v10 = vadd.f32 %v2538_v0, %v2179_v5  ;;  %v6210_v0 = vld [vmem:[#allocation14 + $0x2dc] ss:$28 sps:$4 sm:$0xff]   ;;  %v6219_v5 = vld [vmem:[#allocation14 + $0x624] ss:$28 sps:$4 sm:$0xff]  }
 0x2c2   : > { %v2540_v1 = vpop.f32.mrf.mxu0 }
 0x2c3   : > { %v6213_v1 = vld [vmem:[#allocation14 + $0x65c] ss:$28 sps:$4 sm:$0xff]  }
 0x2c4   : > { %v2541_v2 = vpop.f32.mrf.mxu0 }
 0x2c5   : > { %v6208_v2 = vld [vmem:[#allocation14 + $0x2d8] ss:$28 sps:$4 sm:$0xff]  }
 0x307   : > { %v2577_v9 = vpop.f32.mrf.mxu1 }
 0x308   : > { %v2578_v11 = vadd.f32 %v2577_v9, %v2537_v8  ;;  %v6214_v8 = vld [vmem:[#allocation14 + $0x2a0] ss:$28 sps:$4 sm:$0xff]  }
 0x309   : > { %v2579_v12 = vpop.f32.mrf.mxu1  ;;  %v6217_v9 = vld [vmem:[#allocation14 + $0x620] ss:$28 sps:$4 sm:$0xff]  }
 0x30a   : > { %2584 = vst [vmem:[%s7171_s2] sm:$0xff] %v2578_v11  ;;  %v2580_v15 = vadd.f32 %v2579_v12, %v2539_v10  ;;  %v6222_v10 = vld [vmem:[#allocation14 + $0x26c] ss:$28 sps:$4 sm:$0xff]  }
 0x30b   : > { %v2581_v16 = vpop.f32.mrf.mxu1  ;;  %v6220_v12 = vld [vmem:[#allocation14 + $0x268] ss:$28 sps:$4 sm:$0xff]  }
 0x30c   : > { %2585 = vst [vmem:[%s7171_s2 + $0x8] sm:$0xff] %v2580_v15  ;;  %v2586_v17 = vmul.f32 0.5, %v2580_v15  ;;  %v6223_v15 = vld [vmem:[#allocation14 + $0x5e8] ss:$28 sps:$4 sm:$0xff]   ;;  %v6228_v16 = vld [vmem:[#allocation14 + $0x234] ss:$28 sps:$4 sm:$0xff]  }
 0x30d   : > { %v2582_v18 = vpop.f32.mrf.mxu1  ;;  %s6727_s2 = scalar_lea.vmem %s6726_s24, 512 }
 0x30e   : > { %v2587_v19 = vmul.f32 1.442695, %v2586_v17  ;;  %v6231_v17 = vld [vmem:[#allocation14 + $0x5b4] ss:$28 sps:$4 sm:$0xff]   ;;  %p6729_p8 = scmp.lt.s32.totalorder %s6727_s2, %s6721_s6 }
 0x30f   : > { %v6226_v18 = vld [vmem:[#allocation14 + $0x230] ss:$28 sps:$4 sm:$0xff]  }
 0x310   : > { %6468 = vpow2.f32 %v2587_v19  ;;  %v6229_v19 = vld [vmem:[#allocation14 + $0x5b0] ss:$28 sps:$4 sm:$0xff]   ;;  %p6730_p4 = por %p6729_p8, %p6728_p0 }
 0x312   : > { %p6731_p9 = pnand %p6730_p4, %p6724_p11 }
 0x31d   : > { %v6469_v21 = vpop.eup %6468 }
 0x31e   : > { %v2590_v22 = vmul.f32 %v6469_v21, %v2589_v20  ;;  %v6234_v20 = vld [vmem:[#allocation14 + $0x1fc] ss:$28 sps:$4 sm:$0xff]  }
 0x31f   : > { %v6237_v21 = vld [vmem:[#allocation14 + $0x57c] ss:$28 sps:$4 sm:$0xff]  }
 0x320   : > { %v2591_v23 = vadd.f32 %v2590_v22, %v2578_v11  ;;  %v6225_v11 = vld [vmem:[#allocation14 + $0x5ec] ss:$28 sps:$4 sm:$0xff]   ;;  %v6232_v22 = vld [vmem:[#allocation14 + $0x1f8] ss:$28 sps:$4 sm:$0xff]  }
 0x322   : > { %v2592_v26 = vpack.c.bf16 %v2591_v23, %v2591_v23  ;;  %v6235_v23 = vld [vmem:[#allocation14 + $0x578] ss:$28 sps:$4 sm:$0xff]  }
 0x324   : > { %2840 = vmatmul.mubr.bf16.vlgmr.msra.gmra.mxu0 %v2592_v26  ;;  %2881 = vmatmul.mubr.bf16.vlgmr.msra.gmra.mxu1 %v2592_v26  ;;  %v6238_v26 = vld [vmem:[#allocation14 + $0x1c0] ss:$28 sps:$4 sm:$0xff]  }
 0x325   : > { %4343 = vmatpush1.bf16.msra.mxu0 %v6148_v24  ;;  %4384 = vmatpush1.bf16.msra.mxu1 %v6151_v25  ;;  %v6240_v24 = vld [vmem:[#allocation14 + $0x1c4] ss:$28 sps:$4 sm:$0xff]  }
 0x326   : > { %4344 = vmatprep.subr.bf16.mxu0 %v6156_v27  ;;  %4385 = vmatprep.subr.bf16.mxu1 %v6159_v7  ;;  %v6243_v25 = vld [vmem:[#allocation14 + $0x544] ss:$28 sps:$4 sm:$0xff]   ;;  %v6246_v7 = vld [vmem:[#allocation14 + $0x194] ss:$28 sps:$4 sm:$0xff]  }
 0x327   : > { %v6241_v27 = vld [vmem:[#allocation14 + $0x540] ss:$28 sps:$4 sm:$0xff]  }
 0x329   : > { %4345 = vmatpush1.bf16.msra.mxu0 %v6154_v28  ;;  %4386 = vmatpush1.bf16.msra.mxu1 %v6157_v29  ;;  %v6249_v28 = vld [vmem:[#allocation14 + $0x514] ss:$28 sps:$4 sm:$0xff]   ;;  %v2625_v29 = vld [vmem:[#allocation13] sm:$0xf] }
 0x32a   : > { %4346 = vmatprep.subr.bf16.mxu0 %v6162_v30  ;;  %4387 = vmatprep.subr.bf16.mxu1 %v6165_v31  ;;  %v2630_v30 = vrot.slane %v2625_v29, %v7151_v6  ;;  %v2638_v31 = vrot.slane %v2625_v29, %v7160_v60 }
 0x32d   : > { %4347 = vmatpush1.bf16.msra.mxu0 %v6160_v51  ;;  %4388 = vmatpush1.bf16.msra.mxu1 %v6163_v32  ;;  %v2634_v51 = vrot.slane %v2625_v29, %v7154_v37  ;;  %v2642_v32 = vrot.slane %v2625_v29, %v7163_v61  ;;  %v6300_v29 = vld [vmem:[#allocation14 + $0x31c] ss:$28 sps:$4 sm:$0xff]  }
 0x32e   : > { %4348 = vmatprep.subr.bf16.mxu0 %v6168_v14  ;;  %4389 = vmatprep.subr.bf16.mxu1 %v6171_v34 }
 0x331   : > { %4349 = vmatpush1.bf16.msra.mxu0 %v6166_v36  ;;  %4390 = vmatpush1.bf16.msra.mxu1 %v6169_v38 }
 0x332   : > { %4350 = vmatprep.subr.bf16.mxu0 %v6174_v39  ;;  %4391 = vmatprep.subr.bf16.mxu1 %v6177_v33 }
 0x335   : > { %4351 = vmatpush1.bf16.msra.mxu0 %v6172_v40  ;;  %4392 = vmatpush1.bf16.msra.mxu1 %v6175_v41 }
 0x336   : > { %4352 = vmatprep.subr.bf16.mxu0 %v6180_v13  ;;  %4393 = vmatprep.subr.bf16.mxu1 %v6183_v42 }
 0x339   : > { %4353 = vmatpush1.bf16.msra.mxu0 %v6178_v43  ;;  %4394 = vmatpush1.bf16.msra.mxu1 %v6181_v44 }
 0x33a   : > { %4354 = vmatprep.subr.bf16.mxu0 %v6186_v45  ;;  %4395 = vmatprep.subr.bf16.mxu1 %v6189_v46 }
 0x33d   : > { %4355 = vmatpush1.bf16.msra.mxu0 %v6184_v47  ;;  %4396 = vmatpush1.bf16.msra.mxu1 %v6187_v48 }
 0x33e   : > { %4356 = vmatprep.subr.bf16.mxu0 %v6192_v49  ;;  %4397 = vmatprep.subr.bf16.mxu1 %v6195_v50 }
 0x341   : > { %4357 = vmatpush1.bf16.msra.mxu0 %v6190_v52  ;;  %4398 = vmatpush1.bf16.msra.mxu1 %v6193_v53  ;;  %v6244_v52 = vld [vmem:[#allocation14 + $0x190] ss:$28 sps:$4 sm:$0xff]  }
 0x342   : > { %4358 = vmatprep.subr.bf16.mxu0 %v6198_v54  ;;  %4399 = vmatprep.subr.bf16.mxu1 %v6201_v55  ;;  %v6247_v53 = vld [vmem:[#allocation14 + $0x510] ss:$28 sps:$4 sm:$0xff]  }
 0x345   : > { %4359 = vmatpush2.bf16.msra.mxu0 %v6196_v56  ;;  %4400 = vmatpush2.bf16.msra.mxu1 %v6199_v57  ;;  %v6252_v56 = vld [vmem:[#allocation14 + $0x15c] ss:$28 sps:$4 sm:$0xff]  }
 0x346   : > { %4360 = vmatprep.subr.bf16.mxu0 %v6204_v58  ;;  %4401 = vmatprep.subr.bf16.mxu1 %v6207_v59  ;;  %v6255_v57 = vld [vmem:[#allocation14 + $0x4dc] ss:$28 sps:$4 sm:$0xff]  }
 0x347   : > { %v6250_v58 = vld [vmem:[#allocation14 + $0x158] ss:$28 sps:$4 sm:$0xff]  }
 0x348   : > { %v6253_v59 = vld [vmem:[#allocation14 + $0x4d8] ss:$28 sps:$4 sm:$0xff]  }
 0x349   : > { %4361 = vmatpush2.bf16.msra.mxu0 %v6202_v62  ;;  %4402 = vmatpush2.bf16.msra.mxu1 %v6205_v63  ;;  %v6258_v62 = vld [vmem:[#allocation14 + $0x124] ss:$28 sps:$4 sm:$0xff]  }
 0x34a   : > { %4362 = vmatprep.subr.bf16.mxu0 %v6210_v0  ;;  %4403 = vmatprep.subr.bf16.mxu1 %v6213_v1  ;;  %v6261_v63 = vld [vmem:[#allocation14 + $0x4a4] ss:$28 sps:$4 sm:$0xff]  }
 0x34b   : > { %v6256_v0 = vld [vmem:[#allocation14 + $0x120] ss:$28 sps:$4 sm:$0xff]  }
 0x34c   : > { %v6259_v1 = vld [vmem:[#allocation14 + $0x4a0] ss:$28 sps:$4 sm:$0xff]  }
 0x34d   : > { %4363 = vmatpush2.bf16.msra.mxu0 %v6208_v2  ;;  %4404 = vmatpush2.bf16.msra.mxu1 %v6211_v3  ;;  %v6264_v2 = vld [vmem:[#allocation14 + $0xec] ss:$28 sps:$4 sm:$0xff]  }
 0x34e   : > { %4364 = vmatprep.subr.bf16.mxu0 %v6216_v4  ;;  %4405 = vmatprep.subr.bf16.mxu1 %v6219_v5  ;;  %v6267_v3 = vld [vmem:[#allocation14 + $0x46c] ss:$28 sps:$4 sm:$0xff]  }
 0x34f   : > { %v6262_v4 = vld [vmem:[#allocation14 + $0xe8] ss:$28 sps:$4 sm:$0xff]  }
 0x350   : > { %v6265_v5 = vld [vmem:[#allocation14 + $0x468] ss:$28 sps:$4 sm:$0xff]  }
 0x351   : > { %4365 = vmatpush2.bf16.msra.mxu0 %v6214_v8  ;;  %4406 = vmatpush2.bf16.msra.mxu1 %v6217_v9  ;;  %v6270_v8 = vld [vmem:[#allocation14 + $0xb4] ss:$28 sps:$4 sm:$0xff]  }
 0x352   : > { %4366 = vmatprep.subr.bf16.mxu0 %v6222_v10  ;;  %4407 = vmatprep.subr.bf16.mxu1 %v6225_v11  ;;  %v6273_v9 = vld [vmem:[#allocation14 + $0x434] ss:$28 sps:$4 sm:$0xff]  }
 0x353   : > { %v6268_v10 = vld [vmem:[#allocation14 + $0xb0] ss:$28 sps:$4 sm:$0xff]  }
 0x354   : > { %v6271_v11 = vld [vmem:[#allocation14 + $0x430] ss:$28 sps:$4 sm:$0xff]  }
 0x355   : > { %4367 = vmatpush2.bf16.msra.mxu0 %v6220_v12  ;;  %4408 = vmatpush2.bf16.msra.mxu1 %v6223_v15  ;;  %v6276_v12 = vld [vmem:[#allocation14 + $0x7c] ss:$28 sps:$4 sm:$0xff]  }
 0x356   : > { %4368 = vmatprep.subr.bf16.mxu0 %v6228_v16  ;;  %4409 = vmatprep.subr.bf16.mxu1 %v6231_v17  ;;  %v6279_v15 = vld [vmem:[#allocation14 + $0x3fc] ss:$28 sps:$4 sm:$0xff]  }
 0x357   : > { %v6274_v16 = vld [vmem:[#allocation14 + $0x78] ss:$28 sps:$4 sm:$0xff]  }
 0x358   : > { %v6277_v17 = vld [vmem:[#allocation14 + $0x3f8] ss:$28 sps:$4 sm:$0xff]  }
 0x359   : > { %4369 = vmatpush2.bf16.msra.mxu0 %v6226_v18  ;;  %4410 = vmatpush2.bf16.msra.mxu1 %v6229_v19  ;;  %v6282_v18 = vld [vmem:[#allocation14 + $0x44] ss:$28 sps:$4 sm:$0xff]  }
 0x35a   : > { %4370 = vmatprep.subr.bf16.mxu0 %v6234_v20  ;;  %4411 = vmatprep.subr.bf16.mxu1 %v6237_v21  ;;  %v6285_v19 = vld [vmem:[#allocation14 + $0x3c4] ss:$28 sps:$4 sm:$0xff]  }
 0x35b   : > { %v6280_v20 = vld [vmem:[#allocation14 + $0x40] ss:$28 sps:$4 sm:$0xff]  }
 0x35c   : > { %v6283_v21 = vld [vmem:[#allocation14 + $0x3c0] ss:$28 sps:$4 sm:$0xff]  }
 0x35d   : > { %4371 = vmatpush2.bf16.msra.mxu0 %v6232_v22  ;;  %4412 = vmatpush2.bf16.msra.mxu1 %v6235_v23  ;;  %v6288_v22 = vld [vmem:[#allocation14 + $0xc] ss:$28 sps:$4 sm:$0xff]  }
 0x35e   : > { %4372 = vmatprep.subr.bf16.mxu0 %v6240_v24  ;;  %4413 = vmatprep.subr.bf16.mxu1 %v6243_v25  ;;  %v6291_v23 = vld [vmem:[#allocation14 + $0x38c] ss:$28 sps:$4 sm:$0xff]  }
 0x35f   : > { %v6286_v24 = vld [vmem:[#allocation14 + $0x8] ss:$28 sps:$4 sm:$0xff]  }
 0x360   : > { %v6289_v25 = vld [vmem:[#allocation14 + $0x388] ss:$28 sps:$4 sm:$0xff]  }
 0x361   : > { %4373 = vmatpush2.bf16.msra.mxu0 %v6238_v26  ;;  %4414 = vmatpush2.bf16.msra.mxu1 %v6241_v27  ;;  %v6294_v26 = vld [vmem:[#allocation14 + $0x354] ss:$28 sps:$4 sm:$0xff]  }
 0x362   : > { %4424 = vmatprep.subr.bf16.mxu0 %v6246_v7  ;;  %4465 = vmatprep.subr.bf16.mxu1 %v6249_v28  ;;  %v6297_v27 = vld [vmem:[#allocation14 + $0x6d4] ss:$28 sps:$4 sm:$0xff]  }
 0x363   : > { %v6292_v7 = vld [vmem:[#allocation14 + $0x350] ss:$28 sps:$4 sm:$0xff]  }
 0x364   : > { %v6295_v28 = vld [vmem:[#allocation14 + $0x6d0] ss:$28 sps:$4 sm:$0xff]  }
 0x3e4   : > { %v2841_v14 = vpop.f32.mrf.mxu0  ;;  %v2882_v34 = vpop.f32.mrf.mxu1 }
 0x3e5   : > { %v2842_v36 = vadd.f32 %v2841_v14, %v2630_v30  ;;  %v2883_v38 = vadd.f32 %v2882_v34, %v2638_v31  ;;  %v6303_v30 = vld [vmem:[#allocation14 + $0x69c] ss:$28 sps:$4 sm:$0xff]   ;;  %v6309_v14 = vld [vmem:[#allocation14 + $0x664] ss:$28 sps:$4 sm:$0xff]  }
 0x3e6   : > { %v2843_v39 = vpop.f32.mrf.mxu0  ;;  %v2884_v33 = vpop.f32.mrf.mxu1  ;;  %v6298_v31 = vld [vmem:[#allocation14 + $0x318] ss:$28 sps:$4 sm:$0xff]   ;;  %v6304_v34 = vld [vmem:[#allocation14 + $0x2e0] ss:$28 sps:$4 sm:$0xff]  }
 0x3e7   : > { %v2844_v40 = vadd.f32 %v2843_v39, %v2634_v51  ;;  %v2885_v41 = vadd.f32 %v2884_v33, %v2642_v32  ;;  %v2889_v13 = vmax.f32 %v2842_v36, 0.0  ;;  %v2891_v42 = vmax.f32 %v2883_v38, 0.0  ;;  %v6301_v51 = vld [vmem:[#allocation14 + $0x698] ss:$28 sps:$4 sm:$0xff]   ;;  %v6306_v32 = vld [vmem:[#allocation14 + $0x2e4] ss:$28 sps:$4 sm:$0xff]  }
 0x3e8   : > { %v2845_v43 = vpop.f32.mrf.mxu0  ;;  %v2886_v44 = vpop.f32.mrf.mxu1  ;;  %v6307_v36 = vld [vmem:[#allocation14 + $0x660] ss:$28 sps:$4 sm:$0xff]   ;;  %v6312_v38 = vld [vmem:[#allocation14 + $0x2ac] ss:$28 sps:$4 sm:$0xff]  }
 0x3e9   : > { %v2890_v45 = vmax.f32 %v2844_v40, 0.0  ;;  %v2892_v46 = vmax.f32 %v2885_v41, 0.0  ;;  %v7188_v54 = vpack.c.bf16 %v2889_v13, %v2889_v13  ;;  %v7190_v55 = vpack.c.bf16 %v2891_v42, %v2891_v42  ;;  %v6315_v39 = vld [vmem:[#allocation14 + $0x62c] ss:$28 sps:$4 sm:$0xff]   ;;  %v6318_v41 = vld [vmem:[#allocation14 + $0x274] ss:$28 sps:$4 sm:$0xff]  }
 0x3ea   : > { %v2846_v47 = vpop.f32.mrf.mxu0  ;;  %v2887_v48 = vpop.f32.mrf.mxu1  ;;  %v6310_v33 = vld [vmem:[#allocation14 + $0x2a8] ss:$28 sps:$4 sm:$0xff]   ;;  %v6321_v13 = vld [vmem:[#allocation14 + $0x5f4] ss:$28 sps:$4 sm:$0xff]   ;;  %v6324_v44 = vld [vmem:[#allocation14 + $0x23c] ss:$28 sps:$4 sm:$0xff]  }
 0x3eb   : > { %v7184_v49 = vpack.c.bf16 %v2890_v45, %v2890_v45  ;;  %v7186_v50 = vpack.c.bf16 %v2892_v46, %v2892_v46  ;;  %v6313_v40 = vld [vmem:[#allocation14 + $0x628] ss:$28 sps:$4 sm:$0xff]   ;;  %v6316_v42 = vld [vmem:[#allocation14 + $0x270] ss:$28 sps:$4 sm:$0xff]   ;;  %v6327_v45 = vld [vmem:[#allocation14 + $0x5bc] ss:$28 sps:$4 sm:$0xff]  }
 0x3ec   : > { %v6319_v43 = vld [vmem:[#allocation14 + $0x5f0] ss:$28 sps:$4 sm:$0xff]   ;;  %v6322_v46 = vld [vmem:[#allocation14 + $0x238] ss:$28 sps:$4 sm:$0xff]   ;;  %v6330_v48 = vld [vmem:[#allocation14 + $0x204] ss:$28 sps:$4 sm:$0xff]  }
 0x3ed   : > { %4374 = vmatprep.mubr.bf16.mxu0 %v7184_v49  ;;  %4415 = vmatprep.mubr.bf16.mxu1 %v7186_v50  ;;  %v6325_v47 = vld [vmem:[#allocation14 + $0x5b8] ss:$28 sps:$4 sm:$0xff]  }
 0x3ee   : > { %4375 = vmatmul.mubr.bf16.vlgmr.msra.gmra.mxu0 %v7188_v54  ;;  %4416 = vmatmul.mubr.bf16.vlgmr.msra.gmra.mxu1 %v7190_v55 }
 0x3ef   : > { %4425 = vmatpush1.bf16.msra.mxu0 %v6244_v52  ;;  %4466 = vmatpush1.bf16.msra.mxu1 %v6247_v53  ;;  %v6333_v52 = vld [vmem:[#allocation14 + $0x584] ss:$28 sps:$4 sm:$0xff]  }
 0x3f0   : > { %4456 = vmatprep.mubr.bf16.mxu0 %v7184_v49  ;;  %4497 = vmatprep.mubr.bf16.mxu1 %v7186_v50  ;;  %v6328_v53 = vld [vmem:[#allocation14 + $0x200] ss:$28 sps:$4 sm:$0xff]  }
 0x3f1   : > { %4426 = vmatprep.subr.bf16.mxu0 %v6252_v56  ;;  %4467 = vmatprep.subr.bf16.mxu1 %v6255_v57  ;;  %v6331_v56 = vld [vmem:[#allocation14 + $0x580] ss:$28 sps:$4 sm:$0xff]   ;;  %v6336_v57 = vld [vmem:[#allocation14 + $0x1cc] ss:$28 sps:$4 sm:$0xff]  }
 0x3f3   : > { %4427 = vmatpush1.bf16.msra.mxu0 %v6250_v58  ;;  %4468 = vmatpush1.bf16.msra.mxu1 %v6253_v59  ;;  %v6339_v58 = vld [vmem:[#allocation14 + $0x54c] ss:$28 sps:$4 sm:$0xff]  }
 0x3f4   : > { %4428 = vmatprep.subr.bf16.mxu0 %v6258_v62  ;;  %4469 = vmatprep.subr.bf16.mxu1 %v6261_v63  ;;  %v6334_v59 = vld [vmem:[#allocation14 + $0x1c8] ss:$28 sps:$4 sm:$0xff]   ;;  %v6342_v63 = vld [vmem:[#allocation14 + $0x19c] ss:$28 sps:$4 sm:$0xff]  }
 0x3f5   : > { %v6337_v62 = vld [vmem:[#allocation14 + $0x548] ss:$28 sps:$4 sm:$0xff]  }
 0x3f7   : > { %4429 = vmatpush1.bf16.msra.mxu0 %v6256_v0  ;;  %4470 = vmatpush1.bf16.msra.mxu1 %v6259_v1  ;;  %v6345_v0 = vld [vmem:[#allocation14 + $0x51c] ss:$28 sps:$4 sm:$0xff]  }
 0x3f8   : > { %4430 = vmatprep.subr.bf16.mxu0 %v6264_v2  ;;  %4471 = vmatprep.subr.bf16.mxu1 %v6267_v3  ;;  %v6340_v1 = vld [vmem:[#allocation14 + $0x198] ss:$28 sps:$4 sm:$0xff]   ;;  %v6348_v3 = vld [vmem:[#allocation14 + $0x164] ss:$28 sps:$4 sm:$0xff]  }
 0x3f9   : > { %v6343_v2 = vld [vmem:[#allocation14 + $0x518] ss:$28 sps:$4 sm:$0xff]  }
 0x3fb   : > { %4431 = vmatpush1.bf16.msra.mxu0 %v6262_v4  ;;  %4472 = vmatpush1.bf16.msra.mxu1 %v6265_v5  ;;  %v6351_v4 = vld [vmem:[#allocation14 + $0x4e4] ss:$28 sps:$4 sm:$0xff]  }
 0x3fc   : > { %4432 = vmatprep.subr.bf16.mxu0 %v6270_v8  ;;  %4473 = vmatprep.subr.bf16.mxu1 %v6273_v9  ;;  %v6346_v5 = vld [vmem:[#allocation14 + $0x160] ss:$28 sps:$4 sm:$0xff]   ;;  %v6354_v9 = vld [vmem:[#allocation14 + $0x12c] ss:$28 sps:$4 sm:$0xff]  }
 0x3fd   : > { %v6349_v8 = vld [vmem:[#allocation14 + $0x4e0] ss:$28 sps:$4 sm:$0xff]  }
 0x3ff   : > { %4433 = vmatpush1.bf16.msra.mxu0 %v6268_v10  ;;  %4474 = vmatpush1.bf16.msra.mxu1 %v6271_v11  ;;  %v6357_v10 = vld [vmem:[#allocation14 + $0x4ac] ss:$28 sps:$4 sm:$0xff]  }
 0x400   : > { %4434 = vmatprep.subr.bf16.mxu0 %v6276_v12  ;;  %4475 = vmatprep.subr.bf16.mxu1 %v6279_v15  ;;  %v6352_v11 = vld [vmem:[#allocation14 + $0x128] ss:$28 sps:$4 sm:$0xff]   ;;  %v6360_v15 = vld [vmem:[#allocation14 + $0xf4] ss:$28 sps:$4 sm:$0xff]  }
 0x401   : > { %v6355_v12 = vld [vmem:[#allocation14 + $0x4a8] ss:$28 sps:$4 sm:$0xff]  }
 0x403   : > { %4435 = vmatpush1.bf16.msra.mxu0 %v6274_v16  ;;  %4476 = vmatpush1.bf16.msra.mxu1 %v6277_v17  ;;  %v6363_v16 = vld [vmem:[#allocation14 + $0x474] ss:$28 sps:$4 sm:$0xff]  }
 0x404   : > { %4436 = vmatprep.subr.bf16.mxu0 %v6282_v18  ;;  %4477 = vmatprep.subr.bf16.mxu1 %v6285_v19  ;;  %v6358_v17 = vld [vmem:[#allocation14 + $0xf0] ss:$28 sps:$4 sm:$0xff]   ;;  %v6366_v19 = vld [vmem:[#allocation14 + $0xbc] ss:$28 sps:$4 sm:$0xff]  }
 0x405   : > { %v6361_v18 = vld [vmem:[#allocation14 + $0x470] ss:$28 sps:$4 sm:$0xff]  }
 0x407   : > { %4437 = vmatpush1.bf16.msra.mxu0 %v6280_v20  ;;  %4478 = vmatpush1.bf16.msra.mxu1 %v6283_v21  ;;  %v6369_v20 = vld [vmem:[#allocation14 + $0x43c] ss:$28 sps:$4 sm:$0xff]  }
 0x408   : > { %4438 = vmatprep.subr.bf16.mxu0 %v6288_v22  ;;  %4479 = vmatprep.subr.bf16.mxu1 %v6291_v23  ;;  %v6364_v21 = vld [vmem:[#allocation14 + $0xb8] ss:$28 sps:$4 sm:$0xff]   ;;  %v6372_v23 = vld [vmem:[#allocation14 + $0x84] ss:$28 sps:$4 sm:$0xff]  }
 0x409   : > { %v6367_v22 = vld [vmem:[#allocation14 + $0x438] ss:$28 sps:$4 sm:$0xff]  }
 0x40b   : > { %4439 = vmatpush1.bf16.msra.mxu0 %v6286_v24  ;;  %4480 = vmatpush1.bf16.msra.mxu1 %v6289_v25  ;;  %v6375_v24 = vld [vmem:[#allocation14 + $0x404] ss:$28 sps:$4 sm:$0xff]  }
 0x40c   : > { %4440 = vmatprep.subr.bf16.mxu0 %v6294_v26  ;;  %4481 = vmatprep.subr.bf16.mxu1 %v6297_v27  ;;  %v6370_v25 = vld [vmem:[#allocation14 + $0x80] ss:$28 sps:$4 sm:$0xff]   ;;  %v6378_v27 = vld [vmem:[#allocation14 + $0x4c] ss:$28 sps:$4 sm:$0xff]  }
 0x40d   : > { %v6373_v26 = vld [vmem:[#allocation14 + $0x400] ss:$28 sps:$4 sm:$0xff]  }
 0x40f   : > { %4441 = vmatpush2.bf16.msra.mxu0 %v6292_v7  ;;  %4482 = vmatpush2.bf16.msra.mxu1 %v6295_v28  ;;  %v6381_v7 = vld [vmem:[#allocation14 + $0x3cc] ss:$28 sps:$4 sm:$0xff]  }
 0x410   : > { %4442 = vmatprep.subr.bf16.mxu0 %v6300_v29  ;;  %4483 = vmatprep.subr.bf16.mxu1 %v6303_v30  ;;  %v6376_v28 = vld [vmem:[#allocation14 + $0x48] ss:$28 sps:$4 sm:$0xff]   ;;  %v6384_v30 = vld [vmem:[#allocation14 + $0x14] ss:$28 sps:$4 sm:$0xff]  }
 0x411   : > { %v6379_v29 = vld [vmem:[#allocation14 + $0x3c8] ss:$28 sps:$4 sm:$0xff]  }
 0x413   : > { %4443 = vmatpush2.bf16.msra.mxu0 %v6298_v31  ;;  %4484 = vmatpush2.bf16.msra.mxu1 %v6301_v51  ;;  %v6387_v31 = vld [vmem:[#allocation14 + $0x394] ss:$28 sps:$4 sm:$0xff]  }
 0x414   : > { %4444 = vmatprep.subr.bf16.mxu0 %v6306_v32  ;;  %4485 = vmatprep.subr.bf16.mxu1 %v6309_v14  ;;  %v6382_v51 = vld [vmem:[#allocation14 + $0x10] ss:$28 sps:$4 sm:$0xff]   ;;  %v6390_v14 = vld [vmem:[#allocation14 + $0x35c] ss:$28 sps:$4 sm:$0xff]  }
 0x415   : > { %v6385_v32 = vld [vmem:[#allocation14 + $0x390] ss:$28 sps:$4 sm:$0xff]  }
 0x417   : > { %4445 = vmatpush2.bf16.msra.mxu0 %v6304_v34  ;;  %4486 = vmatpush2.bf16.msra.mxu1 %v6307_v36  ;;  %v6393_v34 = vld [vmem:[#allocation14 + $0x6dc] ss:$28 sps:$4 sm:$0xff]  }
 0x418   : > { %4446 = vmatprep.subr.bf16.mxu0 %v6312_v38  ;;  %4487 = vmatprep.subr.bf16.mxu1 %v6315_v39  ;;  %v6388_v36 = vld [vmem:[#allocation14 + $0x358] ss:$28 sps:$4 sm:$0xff]   ;;  %v6396_v39 = vld [vmem:[#allocation14 + $0x324] ss:$28 sps:$4 sm:$0xff]  }
 0x419   : > { %v6391_v38 = vld [vmem:[#allocation14 + $0x6d8] ss:$28 sps:$4 sm:$0xff]  }
 0x41b   : > { %4447 = vmatpush2.bf16.msra.mxu0 %v6310_v33  ;;  %4488 = vmatpush2.bf16.msra.mxu1 %v6313_v40  ;;  %v6399_v33 = vld [vmem:[#allocation14 + $0x6a4] ss:$28 sps:$4 sm:$0xff]  }
 0x41c   : > { %4448 = vmatprep.subr.bf16.mxu0 %v6318_v41  ;;  %4489 = vmatprep.subr.bf16.mxu1 %v6321_v13  ;;  %v6394_v40 = vld [vmem:[#allocation14 + $0x320] ss:$28 sps:$4 sm:$0xff]   ;;  %v6402_v13 = vld [vmem:[#allocation14 + $0x2ec] ss:$28 sps:$4 sm:$0xff]  }
 0x41d   : > { %v6397_v41 = vld [vmem:[#allocation14 + $0x6a0] ss:$28 sps:$4 sm:$0xff]  }
 0x41f   : > { %4449 = vmatpush2.bf16.msra.mxu0 %v6316_v42  ;;  %4490 = vmatpush2.bf16.msra.mxu1 %v6319_v43  ;;  %v6405_v42 = vld [vmem:[#allocation14 + $0x66c] ss:$28 sps:$4 sm:$0xff]  }
 0x420   : > { %4450 = vmatprep.subr.bf16.mxu0 %v6324_v44  ;;  %4491 = vmatprep.subr.bf16.mxu1 %v6327_v45  ;;  %v6400_v43 = vld [vmem:[#allocation14 + $0x2e8] ss:$28 sps:$4 sm:$0xff]   ;;  %v6408_v45 = vld [vmem:[#allocation14 + $0x2b4] ss:$28 sps:$4 sm:$0xff]  }
 0x421   : > { %v6403_v44 = vld [vmem:[#allocation14 + $0x668] ss:$28 sps:$4 sm:$0xff]  }
 0x423   : > { %4451 = vmatpush2.bf16.msra.mxu0 %v6322_v46  ;;  %4492 = vmatpush2.bf16.msra.mxu1 %v6325_v47  ;;  %v6411_v46 = vld [vmem:[#allocation14 + $0x634] ss:$28 sps:$4 sm:$0xff]  }
 0x424   : > { %4452 = vmatprep.subr.bf16.mxu0 %v6330_v48  ;;  %4493 = vmatprep.subr.bf16.mxu1 %v6333_v52  ;;  %v6406_v47 = vld [vmem:[#allocation14 + $0x2b0] ss:$28 sps:$4 sm:$0xff]   ;;  %v6414_v52 = vld [vmem:[#allocation14 + $0x27c] ss:$28 sps:$4 sm:$0xff]  }
 0x425   : > { %v6409_v48 = vld [vmem:[#allocation14 + $0x630] ss:$28 sps:$4 sm:$0xff]  }
 0x427   : > { %4453 = vmatpush2.bf16.msra.mxu0 %v6328_v53  ;;  %4494 = vmatpush2.bf16.msra.mxu1 %v6331_v56  ;;  %v6417_v53 = vld [vmem:[#allocation14 + $0x5fc] ss:$28 sps:$4 sm:$0xff]  }
 0x428   : > { %4454 = vmatprep.subr.bf16.mxu0 %v6336_v57  ;;  %4495 = vmatprep.subr.bf16.mxu1 %v6339_v58  ;;  %v6412_v56 = vld [vmem:[#allocation14 + $0x278] ss:$28 sps:$4 sm:$0xff]   ;;  %v6420_v58 = vld [vmem:[#allocation14 + $0x244] ss:$28 sps:$4 sm:$0xff]  }
 0x429   : > { %v6415_v57 = vld [vmem:[#allocation14 + $0x5f8] ss:$28 sps:$4 sm:$0xff]  }
 0x42b   : > { %4455 = vmatpush2.bf16.msra.mxu0 %v6334_v59  ;;  %4496 = vmatpush2.bf16.msra.mxu1 %v6337_v62  ;;  %v6423_v59 = vld [vmem:[#allocation14 + $0x5c4] ss:$28 sps:$4 sm:$0xff]  }
 0x42c   : > { %4506 = vmatprep.subr.bf16.mxu0 %v6342_v63  ;;  %4547 = vmatprep.subr.bf16.mxu1 %v6345_v0  ;;  %v6418_v62 = vld [vmem:[#allocation14 + $0x240] ss:$28 sps:$4 sm:$0xff]   ;;  %v6426_v0 = vld [vmem:[#allocation14 + $0x20c] ss:$28 sps:$4 sm:$0xff]  }
 0x42d   : > { %v6421_v63 = vld [vmem:[#allocation14 + $0x5c0] ss:$28 sps:$4 sm:$0xff]  }
 0x42e   : > { %4457 = vmatmul.mubr.bf16.vlgmr.msra.gmra.mxu0 %v7188_v54  ;;  %4498 = vmatmul.mubr.bf16.vlgmr.msra.gmra.mxu1 %v7190_v55 }
 0x42f   : > { %4507 = vmatpush1.bf16.msra.mxu0 %v6340_v1  ;;  %4538 = vmatprep.mubr.bf16.mxu0 %v7184_v49  ;;  %v6429_v1 = vld [vmem:[#allocation14 + $0x58c] ss:$28 sps:$4 sm:$0xff]  }
 0x430   : > { %4548 = vmatpush1.bf16.msra.mxu1 %v6343_v2  ;;  %4579 = vmatprep.mubr.bf16.mxu1 %v7186_v50  ;;  %v6424_v2 = vld [vmem:[#allocation14 + $0x208] ss:$28 sps:$4 sm:$0xff]  }
 0x431   : > { %4508 = vmatprep.subr.bf16.mxu0 %v6348_v3  ;;  %4549 = vmatprep.subr.bf16.mxu1 %v6351_v4  ;;  %v6427_v3 = vld [vmem:[#allocation14 + $0x588] ss:$28 sps:$4 sm:$0xff]   ;;  %v6432_v4 = vld [vmem:[#allocation14 + $0x1d4] ss:$28 sps:$4 sm:$0xff]  }
 0x433   : > { %4509 = vmatpush1.bf16.msra.mxu0 %v6346_v5  ;;  %v6435_v5 = vld [vmem:[#allocation14 + $0x554] ss:$28 sps:$4 sm:$0xff]  }
 0x434   : > { %4550 = vmatpush1.bf16.msra.mxu1 %v6349_v8  ;;  %4510 = vmatprep.subr.bf16.mxu0 %v6354_v9  ;;  %v6430_v8 = vld [vmem:[#allocation14 + $0x1d0] ss:$28 sps:$4 sm:$0xff]  }
 0x435   : > { %4551 = vmatprep.subr.bf16.mxu1 %v6357_v10  ;;  %v6433_v9 = vld [vmem:[#allocation14 + $0x550] ss:$28 sps:$4 sm:$0xff]   ;;  %v6436_v10 = vld [vmem:[#allocation14 + $0x360] ss:$28 sps:$4 sm:$0xff]  }
 0x437   : > { %4511 = vmatpush1.bf16.msra.mxu0 %v6352_v11  ;;  %v6437_v11 = vld [vmem:[#allocation14 + $0x6e0] ss:$28 sps:$4 sm:$0xff]  }
 0x438   : > { %4552 = vmatpush1.bf16.msra.mxu1 %v6355_v12  ;;  %4512 = vmatprep.subr.bf16.mxu0 %v6360_v15  ;;  %v6438_v12 = vld [vmem:[#allocation14 + $0x1a0] ss:$28 sps:$4 sm:$0xff]  }
 0x439   : > { %4553 = vmatprep.subr.bf16.mxu1 %v6363_v16  ;;  %v6439_v15 = vld [vmem:[#allocation14 + $0x520] ss:$28 sps:$4 sm:$0xff]   ;;  %v6440_v16 = vld [vmem:[#allocation14 + $0x328] ss:$28 sps:$4 sm:$0xff]  }
 0x43b   : > { %4513 = vmatpush1.bf16.msra.mxu0 %v6358_v17  ;;  %v6441_v17 = vld [vmem:[#allocation14 + $0x6a8] ss:$28 sps:$4 sm:$0xff]  }
 0x43c   : > { %4554 = vmatpush1.bf16.msra.mxu1 %v6361_v18  ;;  %4514 = vmatprep.subr.bf16.mxu0 %v6366_v19  ;;  %v6442_v18 = vld [vmem:[#allocation14 + $0x168] ss:$28 sps:$4 sm:$0xff]  }
 0x43d   : > { %4555 = vmatprep.subr.bf16.mxu1 %v6369_v20  ;;  %v6443_v19 = vld [vmem:[#allocation14 + $0x4e8] ss:$28 sps:$4 sm:$0xff]   ;;  %v6444_v20 = vld [vmem:[#allocation14 + $0x2f0] ss:$28 sps:$4 sm:$0xff]  }
 0x43f   : > { %4515 = vmatpush1.bf16.msra.mxu0 %v6364_v21  ;;  %v6445_v21 = vld [vmem:[#allocation14 + $0x670] ss:$28 sps:$4 sm:$0xff]  }
 0x440   : > { %4556 = vmatpush1.bf16.msra.mxu1 %v6367_v22  ;;  %4516 = vmatprep.subr.bf16.mxu0 %v6372_v23  ;;  %v6446_v22 = vld [vmem:[#allocation14 + $0x130] ss:$28 sps:$4 sm:$0xff]  }
 0x441   : > { %4557 = vmatprep.subr.bf16.mxu1 %v6375_v24  ;;  %v6447_v23 = vld [vmem:[#allocation14 + $0x4b0] ss:$28 sps:$4 sm:$0xff]   ;;  %v6448_v24 = vld [vmem:[#allocation14 + $0x2b8] ss:$28 sps:$4 sm:$0xff]  }
 0x443   : > { %4517 = vmatpush1.bf16.msra.mxu0 %v6370_v25  ;;  %v6449_v25 = vld [vmem:[#allocation14 + $0x638] ss:$28 sps:$4 sm:$0xff]  }
 0x444   : > { %4558 = vmatpush1.bf16.msra.mxu1 %v6373_v26  ;;  %4518 = vmatprep.subr.bf16.mxu0 %v6378_v27  ;;  %v6450_v26 = vld [vmem:[#allocation14 + $0xf8] ss:$28 sps:$4 sm:$0xff]   ;;  %v6452_v27 = vld [vmem:[#allocation14 + $0x280] ss:$28 sps:$4 sm:$0xff]  }
 0x445   : > { %4559 = vmatprep.subr.bf16.mxu1 %v6381_v7  ;;  %v6453_v7 = vld [vmem:[#allocation14 + $0x600] ss:$28 sps:$4 sm:$0xff]  }
 0x447   : > { %4519 = vmatpush1.bf16.msra.mxu0 %v6376_v28  ;;  %v6455_v28 = vld [vmem:[#allocation14 + $0x440] ss:$28 sps:$4 sm:$0xff]  }
 0x448   : > { %4560 = vmatpush1.bf16.msra.mxu1 %v6379_v29  ;;  %4520 = vmatprep.subr.bf16.mxu0 %v6384_v30  ;;  %v6456_v29 = vld [vmem:[#allocation14 + $0x248] ss:$28 sps:$4 sm:$0xff]  }
 0x449   : > { %4561 = vmatprep.subr.bf16.mxu1 %v6387_v31  ;;  %v6457_v30 = vld [vmem:[#allocation14 + $0x5c8] ss:$28 sps:$4 sm:$0xff]  }
 0x44a   : > { %v6458_v31 = vld [vmem:[#allocation14 + $0x88] ss:$28 sps:$4 sm:$0xff]  }
 0x44b   : > { %4521 = vmatpush1.bf16.msra.mxu0 %v6382_v51  ;;  %v6459_v51 = vld [vmem:[#allocation14 + $0x408] ss:$28 sps:$4 sm:$0xff]  }
 0x44c   : > { %4562 = vmatpush1.bf16.msra.mxu1 %v6385_v32  ;;  %4522 = vmatprep.subr.bf16.mxu0 %v6390_v14  ;;  %v6460_v32 = vld [vmem:[#allocation14 + $0x210] ss:$28 sps:$4 sm:$0xff]  }
 0x44d   : > { %4563 = vmatprep.subr.bf16.mxu1 %v6393_v34  ;;  %v6461_v14 = vld [vmem:[#allocation14 + $0x590] ss:$28 sps:$4 sm:$0xff]  }
 0x44e   : > { %v6462_v34 = vld [vmem:[#allocation14 + $0x50] ss:$28 sps:$4 sm:$0xff]  }
 0x44f   : > { %4523 = vmatpush2.bf16.msra.mxu0 %v6388_v36  ;;  %v6463_v36 = vld [vmem:[#allocation14 + $0x3d0] ss:$28 sps:$4 sm:$0xff]  }
 0x450   : > { %4564 = vmatpush2.bf16.msra.mxu1 %v6391_v38  ;;  %4524 = vmatprep.subr.bf16.mxu0 %v6396_v39  ;;  %v6464_v38 = vld [vmem:[#allocation14 + $0x1d8] ss:$28 sps:$4 sm:$0xff]  }
 0x451   : > { %4565 = vmatprep.subr.bf16.mxu1 %v6399_v33  ;;  %v6465_v39 = vld [vmem:[#allocation14 + $0x558] ss:$28 sps:$4 sm:$0xff]  }
 0x452   : > { %v6466_v33 = vld [vmem:[#allocation14 + $0x18] ss:$28 sps:$4 sm:$0xff]  }
 0x453   : > { %4525 = vmatpush2.bf16.msra.mxu0 %v6394_v40  ;;  %v6467_v40 = vld [vmem:[#allocation14 + $0x398] ss:$28 sps:$4 sm:$0xff]  }
 0x454   : > { %4566 = vmatpush2.bf16.msra.mxu1 %v6397_v41  ;;  %4526 = vmatprep.subr.bf16.mxu0 %v6402_v13  ;;  %v7208_v41 = vld [vmem:[#allocation16] sm:$0xff] }
 0x455   : > { %4567 = vmatprep.subr.bf16.mxu1 %v6405_v42  ;;  %v3158_v13 = vrot.slane %v7208_v41, %v7151_v6  ;;  %v3162_v42 = vrot.slane %v7208_v41, %v7154_v37 }
 0x457   : > { %4527 = vmatpush2.bf16.msra.mxu0 %v6400_v43 }
 0x458   : > { %4568 = vmatpush2.bf16.msra.mxu1 %v6403_v44  ;;  %4528 = vmatprep.subr.bf16.mxu0 %v6408_v45 }
 0x459   : > { %4569 = vmatprep.subr.bf16.mxu1 %v6411_v46 }
 0x45b   : > { %4529 = vmatpush2.bf16.msra.mxu0 %v6406_v47 }
 0x45c   : > { %4570 = vmatpush2.bf16.msra.mxu1 %v6409_v48  ;;  %4530 = vmatprep.subr.bf16.mxu0 %v6414_v52 }
 0x45d   : > { %4571 = vmatprep.subr.bf16.mxu1 %v6417_v53 }
 0x45f   : > { %4531 = vmatpush2.bf16.msra.mxu0 %v6412_v56 }
 0x460   : > { %4572 = vmatpush2.bf16.msra.mxu1 %v6415_v57  ;;  %4532 = vmatprep.subr.bf16.mxu0 %v6420_v58 }
 0x461   : > { %4573 = vmatprep.subr.bf16.mxu1 %v6423_v59 }
 0x463   : > { %4533 = vmatpush2.bf16.msra.mxu0 %v6418_v62 }
 0x464   : > { %4574 = vmatpush2.bf16.msra.mxu1 %v6421_v63  ;;  %4534 = vmatprep.subr.bf16.mxu0 %v6426_v0 }
 0x465   : > { %4575 = vmatprep.subr.bf16.mxu1 %v6429_v1 }
 0x467   : > { %4535 = vmatpush2.bf16.msra.mxu0 %v6424_v2 }
 0x468   : > { %4576 = vmatpush2.bf16.msra.mxu1 %v6427_v3  ;;  %4536 = vmatprep.subr.bf16.mxu0 %v6432_v4  ;;  %v3166_v3 = vrot.slane %v7208_v41, %v7160_v60  ;;  %v3170_v4 = vrot.slane %v7208_v41, %v7163_v61 }
 0x469   : > { %4577 = vmatprep.subr.bf16.mxu1 %v6435_v5 }
 0x46b   : > { %4537 = vmatpush2.bf16.msra.mxu0 %v6430_v8 }
 0x46c   : > { %4578 = vmatpush2.bf16.msra.mxu1 %v6433_v9  ;;  %5516 = vmatprep.subr.bf16.mxu0 %v6436_v10 }
 0x46d   : > { %5538 = vmatprep.subr.bf16.mxu1 %v6437_v11 }
 0x46e   : > { %4539 = vmatmul.mubr.bf16.vlgmr.msra.gmra.mxu0 %v7188_v54 }
 0x46f   : > { %4580 = vmatmul.mubr.bf16.vlgmr.msra.gmra.mxu1 %v7190_v55  ;;  %5517 = vmatpush3.bf16.msra.mxu0 %v6438_v12 }
 0x470   : > { %4620 = vmatprep.mubr.bf16.mxu0 %v7184_v49  ;;  %5539 = vmatpush3.bf16.msra.mxu1 %v6439_v15  ;;  %v6451_v49 = vld [vmem:[#allocation14 + $0x478] ss:$28 sps:$4 sm:$0xff]  }
 0x471   : > { %4660 = vmatprep.mubr.bf16.mxu1 %v7186_v50  ;;  %5518 = vmatprep.subr.bf16.mxu0 %v6440_v16  ;;  %v6454_v50 = vld [vmem:[#allocation14 + $0xc0] ss:$28 sps:$4 sm:$0xff]  }
 0x472   : > { %5540 = vmatprep.subr.bf16.mxu1 %v6441_v17 }
 0x473   : > { %5519 = vmatpush3.bf16.msra.mxu0 %v6442_v18 }
 0x474   : > { %5541 = vmatpush3.bf16.msra.mxu1 %v6443_v19  ;;  %5520 = vmatprep.subr.bf16.mxu0 %v6444_v20 }
 0x475   : > { %5542 = vmatprep.subr.bf16.mxu1 %v6445_v21 }
 0x477   : > { %5521 = vmatpush3.bf16.msra.mxu0 %v6446_v22 }
 0x478   : > { %5543 = vmatpush3.bf16.msra.mxu1 %v6447_v23  ;;  %5522 = vmatprep.subr.bf16.mxu0 %v6448_v24 }
 0x479   : > { %5544 = vmatprep.subr.bf16.mxu1 %v6449_v25 }
 0x47b   : > { %5523 = vmatpush3.bf16.msra.mxu0 %v6450_v26 }
 0x47c   : > { %5545 = vmatpush3.bf16.msra.mxu1 %v6451_v49  ;;  %5524 = vmatprep.subr.bf16.mxu0 %v6452_v27 }
 0x47d   : > { %5546 = vmatprep.subr.bf16.mxu1 %v6453_v7 }
 0x47f   : > { %5525 = vmatpush3.bf16.msra.mxu0 %v6454_v50 }
 0x480   : > { %5547 = vmatpush3.bf16.msra.mxu1 %v6455_v28  ;;  %5526 = vmatprep.subr.bf16.mxu0 %v6456_v29 }
 0x481   : > { %5548 = vmatprep.subr.bf16.mxu1 %v6457_v30 }
 0x483   : > { %5527 = vmatpush3.bf16.msra.mxu0 %v6458_v31 }
 0x484   : > { %5549 = vmatpush3.bf16.msra.mxu1 %v6459_v51  ;;  %5528 = vmatprep.subr.bf16.mxu0 %v6460_v32 }
 0x485   : > { %5550 = vmatprep.subr.bf16.mxu1 %v6461_v14 }
 0x487   : > { %5529 = vmatpush3.bf16.msra.mxu0 %v6462_v34 }
 0x488   : > { %5551 = vmatpush3.bf16.msra.mxu1 %v6463_v36  ;;  %5530 = vmatprep.subr.bf16.mxu0 %v6464_v38 }
 0x489   : > { %5552 = vmatprep.subr.bf16.mxu1 %v6465_v39 }
 0x48b   : > { %5531 = vmatpush3.bf16.msra.mxu0 %v6466_v33 }
 0x48c   : > { %5553 = vmatpush3.bf16.msra.mxu1 %v6467_v40 }
 0x48e   : > { %4621 = vmatmul.mubr.bf16.vlgmr.msra.gmra.mxu0 %v7188_v54 }
 0x48f   : > { %4661 = vmatmul.mubr.bf16.vlgmr.msra.gmra.mxu1 %v7190_v55 }
 0x4ae   : > { %v4376_v43 = vpop.f32.mrf.mxu0  ;;  %v4417_v44 = vpop.f32.mrf.mxu1 }
 0x4af   : > { %v4377_v45 = vadd.f32 %v4376_v43, %v3158_v13 }
 0x4b0   : > { %v4378_v46 = vpop.f32.mrf.mxu0  ;;  %v4419_v47 = vpop.f32.mrf.mxu1 }
 0x4b1   : > { %v4418_v48 = vadd.f32 %v4417_v44, %v4377_v45  ;;  %v4379_v52 = vadd.f32 %v4378_v46, %v3162_v42 }
 0x4b2   : > { %v4380_v53 = vpop.f32.mrf.mxu0  ;;  %v4421_v54 = vpop.f32.mrf.mxu1 }
 0x4b3   : > { %v4668_v56 = vmul.f32 0.5, %v4418_v48  ;;  %v4420_v55 = vadd.f32 %v4419_v47, %v4379_v52 }
 0x4b4   : > { %v4381_v57 = vpop.f32.mrf.mxu0  ;;  %v4422_v58 = vpop.f32.mrf.mxu1 }
 0x4b5   : > { %6470 = vtanh.f32 %v4668_v56  ;;  %v4669_v59 = vmul.f32 0.5, %v4420_v55 }
 0x4b7   : > { %6472 = vtanh.f32 %v4669_v59 }
 0x4c2   : > { %v6471_v6 = vpop.eup %6470 }
 0x4c3   : > { %v4682_v37 = vadd.f32 1.0, %v6471_v6 }
 0x4c4   : > { %v6473_v62 = vpop.eup %6472 }
 0x4c5   : > { %v4683_v63 = vadd.f32 1.0, %v6473_v62  ;;  %v4689_v0 = vmul.f32 0.5, %v4682_v37 }
 0x4c7   : > { %v4690_v1 = vmul.f32 0.5, %v4683_v63 }
 0x4c9   : > { %v5511_v2 = vpack.c.bf16 %v4690_v1, %v4689_v0 }
 0x4cb   : > { %4725 = vst [vmem:[%s7216_s29] sm:$0xff] %v5511_v2 }
 0x4ee   : > { %v4458_v5 = vpop.f32.mrf.mxu0  ;;  %v4499_v8 = vpop.f32.mrf.mxu1 }
 0x4ef   : > { %v4459_v9 = vadd.f32 %v4458_v5, %v3166_v3 }
 0x4f0   : > { %v4460_v10 = vpop.f32.mrf.mxu0  ;;  %v4501_v11 = vpop.f32.mrf.mxu1 }
 0x4f1   : > { %v4500_v12 = vadd.f32 %v4499_v8, %v4459_v9  ;;  %v4461_v15 = vadd.f32 %v4460_v10, %v3170_v4 }
 0x4f2   : > { %v4462_v60 = vpop.f32.mrf.mxu0  ;;  %v4503_v16 = vpop.f32.mrf.mxu1 }
 0x4f3   : > { %6734 = shalt.err (!%p6731_p9)
}
 0x4f4   : > { %s6735_s12 = scalar_lea.hbm %s7228_s4, 256  ;;  %s6739_s15 = scalar_lea.hbm %s7303_s11, 512 }
 0x4f5   : > { %p6736_p7 = scmp.ne.s32.totalorder %s7228_s4, %s6735_s12  ;;  %p6740_p13 = scmp.lt.s32.totalorder %s7228_s4, %s7303_s11 }
 0x4f6   : > { %p6741_p6 = scmp.lt.s32.totalorder %s6739_s15, %s6735_s12 }
 0x4f7   : > { %p6737_p3 = pnand %p6736_p7, %p7338_p10 }
 0x4f8   : > { %p6742_p5 = por %p6741_p6, %p6740_p13 }
 0x4f9   : > { %p6738_p12 = pneg %p6737_p3 }
 0x4fb   : > { %p6743_p2 = pnand %p6742_p5, %p6738_p12 }
 0x4fd   : > { %6746 = shalt.err (!%p6743_p2)
}
 0x4fe   : > { %5599 = dma.vmem_to_hbm [thread:$0]  (%p7338_p10), %s4764_s26, 256, %s7228_s4, %s4735_s5   ;;  %v4670_v61 = vmul.f32 0.5, %v4500_v12  ;;  %v4502_v17 = vadd.f32 %v4501_v11, %v4461_v15  ;;  %v4463_v18 = vpop.f32.mrf.mxu0  ;;  %v4504_v19 = vpop.f32.mrf.mxu1  ;;  %v3173_v27 = vsub.s32 4, %v7148_v35  ;;  %v3177_v7 = vsub.s32 5, %v7148_v35 }
 0x4ff   : > { %v3181_v53 = vsub.s32 6, %v7148_v35  ;;  %s5563_s26 = smul.u32 448, %s6932_s23  ;;  %s4749_s13 = sshll.u32 %s7216_s29, 4  ;;  %s4750_s13 = int_to_ptr.vmem [resolvable:$true] %s4749_s13 }
 0x500   : > { %6474 = vtanh.f32 %v4670_v61  ;;  %v4671_v20 = vmul.f32 0.5, %v4502_v17  ;;  %v3174_v50 = vrot.slane %v7208_v41, %v3173_v27  ;;  %v3178_v28 = vrot.slane %v7208_v41, %v3177_v7  ;;  %s4730_s1 = scalar_lea.sflag [#allocation4], %s7081_s3  ;;  %s6747_s24 = scalar_lea.vmem %s4750_s13, 448 }
 0x501   : > { %v3182_v55 = vrot.slane %v7208_v41, %v3181_v53  ;;  %s4747_s6 = scalar_lea.hbm %s7302_s10, %s5563_s26  ;;  %p6748_p1 = scmp.ne.s32.totalorder %s4750_s13, %s6747_s24 }
 0x502   : > { %6476 = vtanh.f32 %v4671_v20  ;;  %s6850_s2 = smov [#allocation17]  }
 0x503   : > { %p6749_p11 = pnand %p6748_p1, %p7338_p10  ;;  %s6751_s12 = sshll.u32 %s6850_s2, 4  ;;  %s6752_s12 = int_to_ptr.vmem [resolvable:$false] %s6751_s12 }
 0x504   : > { %s6753_s22 = scalar_lea.vmem %s6752_s12, 896  ;;  %p6754_p8 = scmp.lt.s32.totalorder %s4750_s13, %s6752_s12 }
 0x505   : > { %p6750_p0 = pneg %p6749_p11  ;;  %p6755_p4 = scmp.lt.s32.totalorder %s6753_s22, %s6747_s24 }
 0x507   : > { %p6756_p9 = por %p6755_p4, %p6754_p8 }
 0x509   : > { %p6757_p7 = pnand %p6756_p9, %p6750_p0 }
 0x50d   : > { %v6475_v21 = vpop.eup %6474 }
 0x50e   : > { %v4684_v22 = vadd.f32 1.0, %v6475_v21 }
 0x50f   : > { %v6477_v23 = vpop.eup %6476 }
 0x510   : > { %v4685_v24 = vadd.f32 1.0, %v6477_v23  ;;  %v4691_v25 = vmul.f32 0.5, %v4684_v22 }
 0x512   : > { %v4692_v26 = vmul.f32 0.5, %v4685_v24 }
 0x514   : > { %v5512_v49 = vpack.c.bf16 %v4692_v26, %v4691_v25 }
 0x516   : > { %4726 = vst [vmem:[%s7216_s29 + $0x8] sm:$0xff] %v5512_v49 }
 0x52e   : > { %v4540_v29 = vpop.f32.mrf.mxu0 }
 0x52f   : > { %v4541_v30 = vadd.f32 %v4540_v29, %v3174_v50  ;;  %v4581_v31 = vpop.f32.mrf.mxu1 }
 0x530   : > { %v4542_v51 = vpop.f32.mrf.mxu0 }
 0x531   : > { %v4582_v32 = vadd.f32 %v4581_v31, %v4541_v30  ;;  %v4543_v14 = vadd.f32 %v4542_v51, %v3178_v28  ;;  %v4583_v34 = vpop.f32.mrf.mxu1 }
 0x532   : > { %v4544_v36 = vpop.f32.mrf.mxu0 }
 0x533   : > { %v4672_v38 = vmul.f32 0.5, %v4582_v32  ;;  %v4584_v39 = vadd.f32 %v4583_v34, %v4543_v14  ;;  %v4585_v33 = vpop.f32.mrf.mxu1 }
 0x534   : > { %v4545_v40 = vpop.f32.mrf.mxu0 }
 0x535   : > { %6478 = vtanh.f32 %v4672_v38  ;;  %v4673_v13 = vmul.f32 0.5, %v4584_v39  ;;  %v4586_v42 = vpop.f32.mrf.mxu1 }
 0x537   : > { %6480 = vtanh.f32 %v4673_v13 }
 0x542   : > { %v6479_v43 = vpop.eup %6478 }
 0x543   : > { %v4686_v44 = vadd.f32 1.0, %v6479_v43 }
 0x544   : > { %v6481_v45 = vpop.eup %6480 }
 0x545   : > { %v4687_v46 = vadd.f32 1.0, %v6481_v45  ;;  %v4693_v47 = vmul.f32 0.5, %v4686_v44 }
 0x547   : > { %v4694_v48 = vmul.f32 0.5, %v4687_v46 }
 0x549   : > { %v5513_v52 = vpack.c.bf16 %v4694_v48, %v4693_v47 }
 0x54b   : > { %4727 = vst [vmem:[%s7216_s29 + $0x10] sm:$0xff] %v5513_v52 }
 0x54e   : > { %v5532_v54 = vpop.f32.mrf.mxu0 }
 0x54f   : > { %v5554_v56 = vpop.f32.mrf.mxu1 }
 0x550   : > { %v5533_v57 = vpop.f32.mrf.mxu0 }
 0x551   : > { %v5534_v58 = vadd.f32 %v5533_v57, %v5532_v54  ;;  %v5555_v59 = vpop.f32.mrf.mxu1 }
 0x552   : > { %v5535_v6 = vpop.f32.mrf.mxu0  ;;  %v5556_v62 = vadd.f32 %v5555_v59, %v5554_v56 }
 0x553   : > { %v4623_v37 = vadd.f32 %v5534_v58, %v3182_v55  ;;  %v5557_v63 = vpop.f32.mrf.mxu1 }
 0x554   : > { %v5536_v0 = vpop.f32.mrf.mxu0 }
 0x555   : > { %v4663_v1 = vadd.f32 %v5556_v62, %v4623_v37  ;;  %v5558_v2 = vpop.f32.mrf.mxu1 }
 0x557   : > { %v4674_v35 = vmul.f32 0.5, %v4663_v1 }
 0x559   : > { %6482 = vtanh.f32 %v4674_v35 }
 0x566   : > { %v6483_v3 = vpop.eup %6482 }
 0x567   : > { %v4688_v4 = vadd.f32 1.0, %v6483_v3 }
 0x569   : > { %v4695_v41 = vmul.f32 0.5, %v4688_v4 }
 0x56b   : > { %v5514_v5 = vpack.c.bf16 %v4695_v41, %v4695_v41 }
 0x56d   : > { %4728 = vst [vmem:[%s7216_s29 + $0x18] sm:$0xf] %v5514_v5 }
 0x56e   : > { %6760 = shalt.err (!%p6757_p7)
}
 0x56f   : > { %s6761_s23 = scalar_lea.hbm %s4747_s6, 448  ;;  %s6765_s30 = scalar_lea.hbm %s7302_s10, 896 }
 0x570   : > { %p6762_p3 = scmp.ne.s32.totalorder %s4747_s6, %s6761_s23  ;;  %p6766_p6 = scmp.lt.s32.totalorder %s4747_s6, %s7302_s10 }
 0x571   : > { %p6767_p5 = scmp.lt.s32.totalorder %s6765_s30, %s6761_s23 }
 0x572   : > { %p6763_p12 = pnand %p6762_p3, %p7338_p10 }
 0x573   : > { %p6768_p2 = por %p6767_p5, %p6766_p6 }
 0x574   : > { %p6764_p13 = pneg %p6763_p12 }
 0x576   : > { %p6769_p1 = pnand %p6768_p2, %p6764_p13 }
 0x578   : > { %6772 = shalt.err (!%p6769_p1)
}
 0x579   : > { %5598 = dma.vmem_to_hbm [thread:$0]  (%p7338_p10), %s4750_s13, 448, %s4747_s6, %s4730_s1  }
 0x57a PF: > { %s4775_s16 = sand.u32 1, %s6819_s17   ;;  %p7339_p11 = scmp.ne.s32.totalorder %s7326_s21, 0 }
 0x57b   : > { %p7340_p0 = scmp.ge.s32.totalorder %s6831_s20, 2  ;;  %s4776_s26 = scalar_lea.sflag [#allocation4], %s4775_s16 }
 0x57d   : > { %p5632_p8 = pnand %p7340_p0, %p7339_p11 }
 0x57f   : > { %p5633_p4 = pneg %p5632_p8 }
 0x581   : > { %6810 = dma.done.wait (%p5633_p4), %s4776_s26, 448  }
 0x582   : > { %6812 = vsyncadd (%p5633_p4), %s4776_s26, 4294966848  ;;  %s4785_s4 = scalar_lea.sflag [#allocation19], %s4775_s16 }
 0x583   : > { %6814 = dma.done.wait (%p5633_p4), %s4785_s4, 256  }
 0x584   : > { %6816 = vsyncadd (%p5633_p4), %s4785_s4, 4294967040  ;;  %p32_p10 = scmp.ge.s32.totalorder %s7024_s27, 4   ;;  %s7341_s17 = smov %s6823_s18 }
 0x585   : > { %s7342_s18 = smov %s6827_s19  ;;  %s7343_s19 = smov %s7035_s14 }
 0x586   : > { %s7344_s20 = smov %s7024_s27  ;;  %34 = sbr.rel (!%p32_p10) target bundleno = 18 (0x12), region = 157 }
 0x58b   :  { %4790 = vsyncpa [#allocation3], 1 }
 0x58c   :  { %4792 = vsyncpa [#allocation3 + $0x1], 1 }
 0x58d   :  { %4793 = vsyncpa [#allocation6], 1 }
 0x58e   :  { %4794 = vsyncpa [#allocation9], 1 }
 0x58f   :  { %4795 = vsyncpa [#allocation12], 1 }
 0x590   :  { %4796 = vsyncpa [#allocation15], 1 }
 0x591   :  { %4797 = vsyncpa [#allocation4], 1 }
 0x592   :  { %4799 = vsyncpa [#allocation4 + $0x1], 1 }
 0x593   :  { %4800 = vsyncpa [#allocation19], 1 }
 0x594   :  { %4802 = vsyncpa [#allocation19 + $0x1], 1 }

</bundles_post_ra>
